<compile_context>
chip_gen: v7x
topology: tpu7x:2x2x1
jax: 0.10.0
libtpu: 0.0.40
codegen_flags: <defaults>
</compile_context>

<pallas_src>
import functools

import jax
import jax.numpy as jnp
import numpy as np
from jax import lax
from jax.experimental import pallas as pl
from jax.experimental.pallas import tpu as pltpu

_BN_EPS = 1e-5
_LANE = 128
# Sweep 512-2048 at real ResNet sizes; kept small here so the demo shapes still
# exercise a multi-step grid (and the pl.when accumulator-init path).
_TILE_M_MAX = 256
_VMEM_LIMIT = 32 * 1024 * 1024   # fits every generation's scoped VMEM comfortably


def _round_up(x, m):
    return (x + m - 1) // m * m


def _pad2d(a, rows, cols):
    r, c = a.shape
    return jnp.pad(a, ((0, rows - r), (0, cols - c)))


# ----------------------------- Pallas kernels ------------------------------ #

def _gemm_stats_kernel(p_ref, w_ref, y_ref, sum_ref, sq_ref):
    """One M-row tile of the conv GEMM + running per-channel sum / sum-of-squares."""
    @pl.when(pl.program_id(0) == 0)
    def _():
        sum_ref[...] = jnp.zeros_like(sum_ref)
        sq_ref[...] = jnp.zeros_like(sq_ref)

    y = jnp.dot(p_ref[...], w_ref[...], preferred_element_type=jnp.float32)
    y_ref[...] = y
    sum_ref[...] += jnp.sum(y, axis=0, keepdims=True)
    sq_ref[...] += jnp.sum(y * y, axis=0, keepdims=True)


def _bn_stats(sum_ref, sq_ref, inv_m):
    mean = sum_ref[...] * inv_m
    var = jnp.maximum(sq_ref[...] * inv_m - mean * mean, 0.0)
    return mean, var


def _bn_relu_kernel(y_ref, sum_ref, sq_ref, g_ref, b_ref, o_ref, *, inv_m):
    mean, var = _bn_stats(sum_ref, sq_ref, inv_m)
    scale = lax.rsqrt(var + _BN_EPS) * g_ref[...]
    o_ref[...] = jnp.maximum((y_ref[...] - mean) * scale + b_ref[...], 0.0
                             ).astype(o_ref.dtype)


def _bn_add_relu_kernel(y_ref, sum_ref, sq_ref, g_ref, b_ref, xs_ref, o_ref, *,
                        inv_m):
    mean, var = _bn_stats(sum_ref, sq_ref, inv_m)
    scale = lax.rsqrt(var + _BN_EPS) * g_ref[...]
    fx = (y_ref[...] - mean) * scale + b_ref[...]
    o_ref[...] = jnp.maximum(fx + xs_ref[...], 0.0).astype(o_ref.dtype)


def _bn_proj_add_relu_kernel(y_ref, sum_ref, sq_ref, g_ref, b_ref, xs_ref, w3_ref,
                             o_ref, *, inv_m):
    mean, var = _bn_stats(sum_ref, sq_ref, inv_m)
    scale = lax.rsqrt(var + _BN_EPS) * g_ref[...]
    fx = (y_ref[...] - mean) * scale + b_ref[...]
    sc = jnp.dot(xs_ref[...], w3_ref[...], preferred_element_type=jnp.float32)
    o_ref[...] = jnp.maximum(fx + sc, 0.0).astype(o_ref.dtype)


# ----------------------------- pallas_call wrappers ------------------------ #

def _row_spec(tile_m, cols):
    return pl.BlockSpec((tile_m, cols), lambda i: (i, 0))


def _bcast_spec(rows, cols):
    return pl.BlockSpec((rows, cols), lambda i: (0, 0))


def _conv_gemm_stats(patches, weights, tile_m):
    """patches (M_pad, K_pad) bf16 @ weights (K_pad, Cp) bf16 ->
       y (M_pad, Cp) f32 plus per-channel sum / sum-of-squares (1, Cp) f32."""
    m_pad, k_pad = patches.shape
    cp = weights.shape[1]
    return pl.pallas_call(
        _gemm_stats_kernel,
        out_shape=(jax.ShapeDtypeStruct((m_pad, cp), jnp.float32),
                   jax.ShapeDtypeStruct((1, cp), jnp.float32),
                   jax.ShapeDtypeStruct((1, cp), jnp.float32)),
        grid=(m_pad // tile_m,),
        in_specs=[_row_spec(tile_m, k_pad), _bcast_spec(k_pad, cp)],
        out_specs=(_row_spec(tile_m, cp), _bcast_spec(1, cp), _bcast_spec(1, cp)),
        compiler_params=pltpu.CompilerParams(
            dimension_semantics=("arbitrary",),   # resident stats accumulator
            vmem_limit_bytes=_VMEM_LIMIT),
    )(patches, weights)


def _bn_pass(kernel, tile_m, out_dtype, y, s, q, g, b, *extra, extra_specs=()):
    """Tiled normalize + affine + ReLU (+ optional shortcut operands)."""
    m_pad, cp = y.shape
    return pl.pallas_call(
        kernel,
        out_shape=jax.ShapeDtypeStruct((m_pad, cp), out_dtype),
        grid=(m_pad // tile_m,),
        in_specs=[_row_spec(tile_m, cp),
                  _bcast_spec(1, cp), _bcast_spec(1, cp),
                  _bcast_spec(1, cp), _bcast_spec(1, cp),
                  *extra_specs],
        out_specs=_row_spec(tile_m, cp),
        compiler_params=pltpu.CompilerParams(
            dimension_semantics=("parallel",),    # independent row tiles
            vmem_limit_bytes=_VMEM_LIMIT),
    )(y, s, q, g, b, *extra)


# ------------------------------- glue helpers ------------------------------ #

def _im2col_3x3(x_nhwc, stride):
    """3x3 / padding=1 im2col.  Returns (M, 9*C) patches, rows ordered (n, ho, wo)."""
    N, H, W, C = x_nhwc.shape
    Ho = (H + 2 - 3) // stride + 1
    Wo = (W + 2 - 3) // stride + 1
    xp = jnp.pad(x_nhwc, ((0, 0), (1, 1), (1, 1), (0, 0)))
    cols = []
    for kh in range(3):
        for kw in range(3):
            cols.append(xp[:, kh:kh + (Ho - 1) * stride + 1:stride,
                            kw:kw + (Wo - 1) * stride + 1:stride, :])
    patches = jnp.stack(cols, axis=3)              # (N, Ho, Wo, 9, C)
    return patches.reshape(N * Ho * Wo, 9 * C), (N, Ho, Wo)


def _w3x3_to_gemm(w):
    """(Cout, Cin, 3, 3) -> (9*Cin, Cout), row order (kh, kw, cin) matching im2col."""
    cout, cin = w.shape[0], w.shape[1]
    return jnp.transpose(w, (2, 3, 1, 0)).reshape(9 * cin, cout)


# ------------------------------- ResBlock fwd ------------------------------ #

def resblock_forward(x_nchw, params, stride=1):
    x = jnp.transpose(x_nchw, (0, 2, 3, 1)).astype(jnp.float32)      # NHWC
    N, H, W, Cin = x.shape
    Cout = params["w1"].shape[0]
    has_proj = (Cin != Cout) or (stride != 1)

    cp = _round_up(Cout, _LANE)                    # lane-dense output channels

    # ---------------- Conv1 -> BN1 -> ReLU ----------------
    p1, (n, ho, wo) = _im2col_3x3(x, stride)
    M = n * ho * wo
    tile_m = min(_TILE_M_MAX, _round_up(M, 16))
    m_pad = _round_up(M, tile_m)
    inv_m = 1.0 / M                                # BN stats over the *real* rows

    k1 = _round_up(9 * Cin, _LANE)
    p1 = _pad2d(p1, m_pad, k1).astype(jnp.bfloat16)
    w1 = _pad2d(_w3x3_to_gemm(params["w1"]), k1, cp).astype(jnp.bfloat16)
    g1 = _pad2d(params["g1"].reshape(1, Cout).astype(jnp.float32), 1, cp)
    b1 = _pad2d(params["b1"].reshape(1, Cout).astype(jnp.float32), 1, cp)

    y1, s1, q1 = _conv_gemm_stats(p1, w1, tile_m)
    h1 = _bn_pass(functools.partial(_bn_relu_kernel, inv_m=inv_m),
                  tile_m, jnp.bfloat16, y1, s1, q1, g1, b1)          # bf16 out

    # ---------------- Conv2 -> BN2 -> (+shortcut) -> ReLU ----------------
    h1_nhwc = h1[:M, :Cout].reshape(n, ho, wo, Cout)                 # bf16
    p2, _ = _im2col_3x3(h1_nhwc, 1)
    k2 = _round_up(9 * Cout, _LANE)
    p2 = _pad2d(p2, m_pad, k2)                                       # still bf16
    w2 = _pad2d(_w3x3_to_gemm(params["w2"]), k2, cp).astype(jnp.bfloat16)
    g2 = _pad2d(params["g2"].reshape(1, Cout).astype(jnp.float32), 1, cp)
    b2 = _pad2d(params["b2"].reshape(1, Cout).astype(jnp.float32), 1, cp)

    y2, s2, q2 = _conv_gemm_stats(p2, w2, tile_m)

    if has_proj:
        cinp = _round_up(Cin, _LANE)
        xs = x[:, ::stride, ::stride, :].reshape(M, Cin)             # 1x1-conv input
        xs = _pad2d(xs, m_pad, cinp).astype(jnp.bfloat16)
        w3 = _pad2d(params["w3"].reshape(Cout, Cin).T, cinp, cp).astype(jnp.bfloat16)
        out = _bn_pass(functools.partial(_bn_proj_add_relu_kernel, inv_m=inv_m),
                       tile_m, jnp.float32, y2, s2, q2, g2, b2, xs, w3,
                       extra_specs=(_row_spec(tile_m, cinp), _bcast_spec(cinp, cp)))
    else:
        xs = _pad2d(x.reshape(M, Cin), m_pad, cp)                    # identity, f32
        out = _bn_pass(functools.partial(_bn_add_relu_kernel, inv_m=inv_m),
                       tile_m, jnp.float32, y2, s2, q2, g2, b2, xs,
                       extra_specs=(_row_spec(tile_m, cp),))

    out = out[:M, :Cout].reshape(n, ho, wo, Cout)
    return jnp.transpose(out, (0, 3, 1, 2))                          # back to NCHW


# ------------------------------ pure-JAX reference ------------------------- #

def resblock_reference(x_nchw, params, stride=1, mixed=True):
    """Pure-JAX reference.  mixed=True mirrors the kernel's precision policy
    (bf16 GEMM operands, bf16 h1, f32 accumulation and f32 BatchNorm)."""
    cast = (lambda a: a.astype(jnp.bfloat16)) if mixed else (lambda a: a)

    def conv(a, w, s, pad):
        return lax.conv_general_dilated(
            cast(a), cast(w), window_strides=(s, s),
            padding=[(pad, pad), (pad, pad)],
            dimension_numbers=("NCHW", "OIHW", "NCHW"),
            preferred_element_type=jnp.float32)

    def bn(y, g, b):
        mean = jnp.mean(y, axis=(0, 2, 3), keepdims=True)
        var = jnp.mean((y - mean) ** 2, axis=(0, 2, 3), keepdims=True)
        return (y - mean) * lax.rsqrt(var + _BN_EPS) * g.reshape(1, -1, 1, 1) \
            + b.reshape(1, -1, 1, 1)

    h1 = jax.nn.relu(bn(conv(x_nchw, params["w1"], stride, 1),
                        params["g1"], params["b1"]))
    if mixed:
        h1 = h1.astype(jnp.bfloat16).astype(jnp.float32)
    fx = bn(conv(h1, params["w2"], 1, 1), params["g2"], params["b2"])
    Cin, Cout = x_nchw.shape[1], params["w1"].shape[0]
    if Cin != Cout or stride != 1:
        sc = conv(x_nchw, params["w3"], stride, 0)
    else:
        sc = x_nchw
    return jax.nn.relu(fx + sc)


# ----------------------------------- main ----------------------------------- #

if __name__ == "__main__":
    def make_params(key, cin, cout, has_proj):
        k1, k2, k3 = jax.random.split(key, 3)
        p = {
            "w1": 0.1 * jax.random.normal(k1, (cout, cin, 3, 3), jnp.float32),
            "g1": jnp.ones((cout,), jnp.float32),   # BatchNorm2d default init
            "b1": jnp.zeros((cout,), jnp.float32),
            "w2": 0.1 * jax.random.normal(k2, (cout, cout, 3, 3), jnp.float32),
            "g2": jnp.ones((cout,), jnp.float32),
            "b2": jnp.zeros((cout,), jnp.float32),
        }
        if has_proj:
            p["w3"] = 0.1 * jax.random.normal(k3, (cout, cin, 1, 1), jnp.float32)
        return p

    key = jax.random.PRNGKey(0)
    configs = [
        # (N, Cin, H, W, Cout, stride)
        (2, 4, 16, 16, 8, 1),    # projection shortcut (channel change)
        (2, 4, 16, 16, 8, 2),    # projection shortcut + stride 2
        (2, 8, 16, 16, 8, 1),    # identity shortcut
    ]
    fwd = jax.jit(resblock_forward, static_argnames=("stride",))

    for (N, Cin, H, W, Cout, stride) in configs:
        key, kx, kp = jax.random.split(key, 3)
        x = jax.random.normal(kx, (N, Cin, H, W), jnp.float32)
        has_proj = (Cin != Cout) or (stride != 1)
        params = make_params(kp, Cin, Cout, has_proj)

        out = jax.block_until_ready(fwd(x, params, stride=stride))
        ref = resblock_reference(x, params, stride=stride, mixed=True)
        # bf16 GEMM operands => compare against the precision-matched reference.
        np.testing.assert_allclose(np.asarray(out), np.asarray(ref),
                                   rtol=2e-2, atol=2e-2)

    print("KERNEL_OK")
</pallas_src>

<mosaic_0001>
module attributes {stable_mosaic.version = 11 : i64} {
  func.func @_gemm_stats_kernel(%arg0: i32, %arg1: memref<256x128xbf16, #tpu.memory_space<vmem>>, %arg2: memref<128x128xbf16, #tpu.memory_space<vmem>>, %arg3: memref<256x128xf32, #tpu.memory_space<vmem>>, %arg4: memref<1x128xf32, #tpu.memory_space<vmem>>, %arg5: memref<1x128xf32, #tpu.memory_space<vmem>>) attributes {dimension_semantics = [#tpu.dimension_semantics<arbitrary>], iteration_bounds = array<i64: 2>, scalar_prefetch = 0 : i64, scratch_operands = 0 : i64, tpu.core_type = #tpu.core_type<tc>, window_params = [{transform_indices = @transform_0, window_bounds = array<i64: 256, 128>}, {pipeline_mode = #tpu.pipeline_mode<synchronous>, transform_indices = @transform_1, window_bounds = array<i64: 128, 128>}, {transform_indices = @transform_2, window_bounds = array<i64: 256, 128>}, {pipeline_mode = #tpu.pipeline_mode<synchronous>, transform_indices = @transform_3, window_bounds = array<i64: 1, 128>}, {pipeline_mode = #tpu.pipeline_mode<synchronous>, transform_indices = @transform_4, window_bounds = array<i64: 1, 128>}]} {
    %c0_i32 = arith.constant 0 : i32
    %0 = arith.cmpi eq, %arg0, %c0_i32 : i32
    %1 = arith.extui %0 : i1 to i32
    %c0_i32_0 = arith.constant 0 : i32
    %2 = arith.cmpi ne, %1, %c0_i32_0 : i32
    scf.if %2 {
      %cst_16 = arith.constant 0.000000e+00 : f32
      %18 = vector.broadcast %cst_16 : f32 to vector<1x128xf32>
      %c0_17 = arith.constant 0 : index
      %c0_18 = arith.constant 0 : index
      %19 = vector.load %arg4[%c0_17, %c0_18] : memref<1x128xf32, #tpu.memory_space<vmem>>, vector<1x128xf32>
      tpu.vector_store %arg4[%c0_17, %c0_18], %18 {strides = array<i32>} : memref<1x128xf32, #tpu.memory_space<vmem>>, vector<1x128xf32>,
      %cst_19 = arith.constant 0.000000e+00 : f32
      %20 = vector.broadcast %cst_19 : f32 to vector<1x128xf32>
      %c0_20 = arith.constant 0 : index
      %c0_21 = arith.constant 0 : index
      %21 = vector.load %arg5[%c0_20, %c0_21] : memref<1x128xf32, #tpu.memory_space<vmem>>, vector<1x128xf32>
      tpu.vector_store %arg5[%c0_20, %c0_21], %20 {strides = array<i32>} : memref<1x128xf32, #tpu.memory_space<vmem>>, vector<1x128xf32>,
    } else {
    }
    %c0 = arith.constant 0 : index
    %c0_1 = arith.constant 0 : index
    %3 = vector.load %arg1[%c0, %c0_1] : memref<256x128xbf16, #tpu.memory_space<vmem>>, vector<256x128xbf16>
    %c0_2 = arith.constant 0 : index
    %c0_3 = arith.constant 0 : index
    %4 = vector.load %arg2[%c0_2, %c0_3] : memref<128x128xbf16, #tpu.memory_space<vmem>>, vector<128x128xbf16>
    %cst = arith.constant dense<0.000000e+00> : vector<256x128xf32>
    %5 = tpu.matmul %3, %4, %cst {dimension_numbers = #tpu.dot_dimension_numbers<[1], [0], [0], [1], [0, 0, 1, 1], [], []>} : vector<256x128xbf16>, vector<128x128xbf16>, vector<256x128xf32> -> vector<256x128xf32>
    %c0_4 = arith.constant 0 : index
    %c0_5 = arith.constant 0 : index
    %6 = vector.load %arg3[%c0_4, %c0_5] : memref<256x128xf32, #tpu.memory_space<vmem>>, vector<256x128xf32>
    tpu.vector_store %arg3[%c0_4, %c0_5], %5 {strides = array<i32>} : memref<256x128xf32, #tpu.memory_space<vmem>>, vector<256x128xf32>,
    %c0_6 = arith.constant 0 : index
    %c0_7 = arith.constant 0 : index
    %7 = vector.load %arg4[%c0_6, %c0_7] : memref<1x128xf32, #tpu.memory_space<vmem>>, vector<1x128xf32>
    %cst_8 = arith.constant dense<0.000000e+00> : vector<128xf32>
    %8 = vector.multi_reduction <add>, %5, %cst_8 [0] : vector<256x128xf32> to vector<128xf32>
    %9 = vector.shape_cast %8 : vector<128xf32> to vector<1x128xf32>
    %10 = arith.addf %7, %9 : vector<1x128xf32>
    %c0_9 = arith.constant 0 : index
    %c0_10 = arith.constant 0 : index
    %11 = vector.load %arg4[%c0_9, %c0_10] : memref<1x128xf32, #tpu.memory_space<vmem>>, vector<1x128xf32>
    tpu.vector_store %arg4[%c0_9, %c0_10], %10 {strides = array<i32>} : memref<1x128xf32, #tpu.memory_space<vmem>>, vector<1x128xf32>,
    %c0_11 = arith.constant 0 : index
    %c0_12 = arith.constant 0 : index
    %12 = vector.load %arg5[%c0_11, %c0_12] : memref<1x128xf32, #tpu.memory_space<vmem>>, vector<1x128xf32>
    %13 = arith.mulf %5, %5 : vector<256x128xf32>
    %cst_13 = arith.constant dense<0.000000e+00> : vector<128xf32>
    %14 = vector.multi_reduction <add>, %13, %cst_13 [0] : vector<256x128xf32> to vector<128xf32>
    %15 = vector.shape_cast %14 : vector<128xf32> to vector<1x128xf32>
    %16 = arith.addf %12, %15 : vector<1x128xf32>
    %c0_14 = arith.constant 0 : index
    %c0_15 = arith.constant 0 : index
    %17 = vector.load %arg5[%c0_14, %c0_15] : memref<1x128xf32, #tpu.memory_space<vmem>>, vector<1x128xf32>
    tpu.vector_store %arg5[%c0_14, %c0_15], %16 {strides = array<i32>} : memref<1x128xf32, #tpu.memory_space<vmem>>, vector<1x128xf32>,
    return
  }
  func.func @transform_0(%arg0: i32) -> (i32, i32) {
    %c0_i32 = arith.constant 0 : i32
    %c0_i32_0 = arith.constant 0 : i32
    return %arg0, %c0_i32 : i32, i32
  }
  func.func @transform_1(%arg0: i32) -> (i32, i32) {
    %c0_i32 = arith.constant 0 : i32
    %c0_i32_0 = arith.constant 0 : i32
    %c0_i32_1 = arith.constant 0 : i32
    return %c0_i32, %c0_i32_0 : i32, i32
  }
  func.func @transform_2(%arg0: i32) -> (i32, i32) {
    %c0_i32 = arith.constant 0 : i32
    %c0_i32_0 = arith.constant 0 : i32
    return %arg0, %c0_i32 : i32, i32
  }
  func.func @transform_3(%arg0: i32) -> (i32, i32) {
    %c0_i32 = arith.constant 0 : i32
    %c0_i32_0 = arith.constant 0 : i32
    %c0_i32_1 = arith.constant 0 : i32
    return %c0_i32, %c0_i32_0 : i32, i32
  }
  func.func @transform_4(%arg0: i32) -> (i32, i32) {
    %c0_i32 = arith.constant 0 : i32
    %c0_i32_0 = arith.constant 0 : i32
    %c0_i32_1 = arith.constant 0 : i32
    return %c0_i32, %c0_i32_0 : i32, i32
  }
}

module attributes {stable_mosaic.version = 11 : i64} {
  func.func @_bn_relu_kernel(%arg0: i32, %arg1: memref<256x128xf32, #tpu.memory_space<vmem>>, %arg2: memref<1x128xf32, #tpu.memory_space<vmem>>, %arg3: memref<1x128xf32, #tpu.memory_space<vmem>>, %arg4: memref<1x128xf32, #tpu.memory_space<vmem>>, %arg5: memref<1x128xf32, #tpu.memory_space<vmem>>, %arg6: memref<256x128xbf16, #tpu.memory_space<vmem>>) attributes {dimension_semantics = [#tpu.dimension_semantics<parallel>], iteration_bounds = array<i64: 2>, scalar_prefetch = 0 : i64, scratch_operands = 0 : i64, tpu.core_type = #tpu.core_type<tc>, window_params = [{transform_indices = @transform_0, window_bounds = array<i64: 256, 128>}, {pipeline_mode = #tpu.pipeline_mode<synchronous>, transform_indices = @transform_1, window_bounds = array<i64: 1, 128>}, {pipeline_mode = #tpu.pipeline_mode<synchronous>, transform_indices = @transform_2, window_bounds = array<i64: 1, 128>}, {pipeline_mode = #tpu.pipeline_mode<synchronous>, transform_indices = @transform_3, window_bounds = array<i64: 1, 128>}, {pipeline_mode = #tpu.pipeline_mode<synchronous>, transform_indices = @transform_4, window_bounds = array<i64: 1, 128>}, {transform_indices = @transform_5, window_bounds = array<i64: 256, 128>}]} {
    %c0 = arith.constant 0 : index
    %c0_0 = arith.constant 0 : index
    %0 = vector.load %arg2[%c0, %c0_0] : memref<1x128xf32, #tpu.memory_space<vmem>>, vector<1x128xf32>
    %cst = arith.constant 0.001953125 : f32
    %1 = vector.broadcast %cst : f32 to vector<1x128xf32>
    %2 = arith.mulf %0, %1 : vector<1x128xf32>
    %c0_1 = arith.constant 0 : index
    %c0_2 = arith.constant 0 : index
    %3 = vector.load %arg3[%c0_1, %c0_2] : memref<1x128xf32, #tpu.memory_space<vmem>>, vector<1x128xf32>
    %cst_3 = arith.constant 0.001953125 : f32
    %4 = vector.broadcast %cst_3 : f32 to vector<1x128xf32>
    %5 = arith.mulf %3, %4 : vector<1x128xf32>
    %6 = arith.mulf %2, %2 : vector<1x128xf32>
    %7 = arith.subf %5, %6 : vector<1x128xf32>
    %cst_4 = arith.constant 0.000000e+00 : f32
    %8 = vector.broadcast %cst_4 : f32 to vector<1x128xf32>
    %9 = arith.maximumf %7, %8 : vector<1x128xf32>
    %cst_5 = arith.constant 9.99999974E-6 : f32
    %10 = vector.broadcast %cst_5 : f32 to vector<1x128xf32>
    %11 = arith.addf %9, %10 : vector<1x128xf32>
    %12 = math.rsqrt %11 : vector<1x128xf32>
    %c0_6 = arith.constant 0 : index
    %c0_7 = arith.constant 0 : index
    %13 = vector.load %arg4[%c0_6, %c0_7] : memref<1x128xf32, #tpu.memory_space<vmem>>, vector<1x128xf32>
    %14 = arith.mulf %12, %13 : vector<1x128xf32>
    %c0_8 = arith.constant 0 : index
    %c0_9 = arith.constant 0 : index
    %15 = vector.load %arg1[%c0_8, %c0_9] : memref<256x128xf32, #tpu.memory_space<vmem>>, vector<256x128xf32>
    %16 = vector.broadcast %2 : vector<1x128xf32> to vector<256x128xf32>
    %17 = arith.subf %15, %16 : vector<256x128xf32>
    %18 = vector.broadcast %14 : vector<1x128xf32> to vector<256x128xf32>
    %19 = arith.mulf %17, %18 : vector<256x128xf32>
    %c0_10 = arith.constant 0 : index
    %c0_11 = arith.constant 0 : index
    %20 = vector.load %arg5[%c0_10, %c0_11] : memref<1x128xf32, #tpu.memory_space<vmem>>, vector<1x128xf32>
    %21 = vector.broadcast %20 : vector<1x128xf32> to vector<256x128xf32>
    %22 = arith.addf %19, %21 : vector<256x128xf32>
    %cst_12 = arith.constant 0.000000e+00 : f32
    %23 = vector.broadcast %cst_12 : f32 to vector<256x128xf32>
    %24 = arith.maximumf %22, %23 : vector<256x128xf32>
    %25 = arith.truncf %24 : vector<256x128xf32> to vector<256x128xbf16>
    %c0_13 = arith.constant 0 : index
    %c0_14 = arith.constant 0 : index
    %26 = vector.load %arg6[%c0_13, %c0_14] : memref<256x128xbf16, #tpu.memory_space<vmem>>, vector<256x128xbf16>
    tpu.vector_store %arg6[%c0_13, %c0_14], %25 {strides = array<i32>} : memref<256x128xbf16, #tpu.memory_space<vmem>>, vector<256x128xbf16>,
    return
  }
  func.func @transform_0(%arg0: i32) -> (i32, i32) {
    %c0_i32 = arith.constant 0 : i32
    %c0_i32_0 = arith.constant 0 : i32
    return %arg0, %c0_i32 : i32, i32
  }
  func.func @transform_1(%arg0: i32) -> (i32, i32) {
    %c0_i32 = arith.constant 0 : i32
    %c0_i32_0 = arith.constant 0 : i32
    %c0_i32_1 = arith.constant 0 : i32
    return %c0_i32, %c0_i32_0 : i32, i32
  }
  func.func @transform_2(%arg0: i32) -> (i32, i32) {
    %c0_i32 = arith.constant 0 : i32
    %c0_i32_0 = arith.constant 0 : i32
    %c0_i32_1 = arith.constant 0 : i32
    return %c0_i32, %c0_i32_0 : i32, i32
  }
  func.func @transform_3(%arg0: i32) -> (i32, i32) {
    %c0_i32 = arith.constant 0 : i32
    %c0_i32_0 = arith.constant 0 : i32
    %c0_i32_1 = arith.constant 0 : i32
    return %c0_i32, %c0_i32_0 : i32, i32
  }
  func.func @transform_4(%arg0: i32) -> (i32, i32) {
    %c0_i32 = arith.constant 0 : i32
    %c0_i32_0 = arith.constant 0 : i32
    %c0_i32_1 = arith.constant 0 : i32
    return %c0_i32, %c0_i32_0 : i32, i32
  }
  func.func @transform_5(%arg0: i32) -> (i32, i32) {
    %c0_i32 = arith.constant 0 : i32
    %c0_i32_0 = arith.constant 0 : i32
    return %arg0, %c0_i32 : i32, i32
  }
}

module attributes {stable_mosaic.version = 11 : i64} {
  func.func @_bn_proj_add_relu_kernel(%arg0: i32, %arg1: memref<256x128xf32, #tpu.memory_space<vmem>>, %arg2: memref<1x128xf32, #tpu.memory_space<vmem>>, %arg3: memref<1x128xf32, #tpu.memory_space<vmem>>, %arg4: memref<1x128xf32, #tpu.memory_space<vmem>>, %arg5: memref<1x128xf32, #tpu.memory_space<vmem>>, %arg6: memref<256x128xbf16, #tpu.memory_space<vmem>>, %arg7: memref<128x128xbf16, #tpu.memory_space<vmem>>, %arg8: memref<256x128xf32, #tpu.memory_space<vmem>>) attributes {dimension_semantics = [#tpu.dimension_semantics<parallel>], iteration_bounds = array<i64: 2>, scalar_prefetch = 0 : i64, scratch_operands = 0 : i64, tpu.core_type = #tpu.core_type<tc>, window_params = [{transform_indices = @transform_0, window_bounds = array<i64: 256, 128>}, {pipeline_mode = #tpu.pipeline_mode<synchronous>, transform_indices = @transform_1, window_bounds = array<i64: 1, 128>}, {pipeline_mode = #tpu.pipeline_mode<synchronous>, transform_indices = @transform_2, window_bounds = array<i64: 1, 128>}, {pipeline_mode = #tpu.pipeline_mode<synchronous>, transform_indices = @transform_3, window_bounds = array<i64: 1, 128>}, {pipeline_mode = #tpu.pipeline_mode<synchronous>, transform_indices = @transform_4, window_bounds = array<i64: 1, 128>}, {transform_indices = @transform_5, window_bounds = array<i64: 256, 128>}, {pipeline_mode = #tpu.pipeline_mode<synchronous>, transform_indices = @transform_6, window_bounds = array<i64: 128, 128>}, {transform_indices = @transform_7, window_bounds = array<i64: 256, 128>}]} {
    %c0 = arith.constant 0 : index
    %c0_0 = arith.constant 0 : index
    %0 = vector.load %arg2[%c0, %c0_0] : memref<1x128xf32, #tpu.memory_space<vmem>>, vector<1x128xf32>
    %cst = arith.constant 0.001953125 : f32
    %1 = vector.broadcast %cst : f32 to vector<1x128xf32>
    %2 = arith.mulf %0, %1 : vector<1x128xf32>
    %c0_1 = arith.constant 0 : index
    %c0_2 = arith.constant 0 : index
    %3 = vector.load %arg3[%c0_1, %c0_2] : memref<1x128xf32, #tpu.memory_space<vmem>>, vector<1x128xf32>
    %cst_3 = arith.constant 0.001953125 : f32
    %4 = vector.broadcast %cst_3 : f32 to vector<1x128xf32>
    %5 = arith.mulf %3, %4 : vector<1x128xf32>
    %6 = arith.mulf %2, %2 : vector<1x128xf32>
    %7 = arith.subf %5, %6 : vector<1x128xf32>
    %cst_4 = arith.constant 0.000000e+00 : f32
    %8 = vector.broadcast %cst_4 : f32 to vector<1x128xf32>
    %9 = arith.maximumf %7, %8 : vector<1x128xf32>
    %cst_5 = arith.constant 9.99999974E-6 : f32
    %10 = vector.broadcast %cst_5 : f32 to vector<1x128xf32>
    %11 = arith.addf %9, %10 : vector<1x128xf32>
    %12 = math.rsqrt %11 : vector<1x128xf32>
    %c0_6 = arith.constant 0 : index
    %c0_7 = arith.constant 0 : index
    %13 = vector.load %arg4[%c0_6, %c0_7] : memref<1x128xf32, #tpu.memory_space<vmem>>, vector<1x128xf32>
    %14 = arith.mulf %12, %13 : vector<1x128xf32>
    %c0_8 = arith.constant 0 : index
    %c0_9 = arith.constant 0 : index
    %15 = vector.load %arg1[%c0_8, %c0_9] : memref<256x128xf32, #tpu.memory_space<vmem>>, vector<256x128xf32>
    %16 = vector.broadcast %2 : vector<1x128xf32> to vector<256x128xf32>
    %17 = arith.subf %15, %16 : vector<256x128xf32>
    %18 = vector.broadcast %14 : vector<1x128xf32> to vector<256x128xf32>
    %19 = arith.mulf %17, %18 : vector<256x128xf32>
    %c0_10 = arith.constant 0 : index
    %c0_11 = arith.constant 0 : index
    %20 = vector.load %arg5[%c0_10, %c0_11] : memref<1x128xf32, #tpu.memory_space<vmem>>, vector<1x128xf32>
    %21 = vector.broadcast %20 : vector<1x128xf32> to vector<256x128xf32>
    %22 = arith.addf %19, %21 : vector<256x128xf32>
    %c0_12 = arith.constant 0 : index
    %c0_13 = arith.constant 0 : index
    %23 = vector.load %arg6[%c0_12, %c0_13] : memref<256x128xbf16, #tpu.memory_space<vmem>>, vector<256x128xbf16>
    %c0_14 = arith.constant 0 : index
    %c0_15 = arith.constant 0 : index
    %24 = vector.load %arg7[%c0_14, %c0_15] : memref<128x128xbf16, #tpu.memory_space<vmem>>, vector<128x128xbf16>
    %cst_16 = arith.constant dense<0.000000e+00> : vector<256x128xf32>
    %25 = tpu.matmul %23, %24, %cst_16 {dimension_numbers = #tpu.dot_dimension_numbers<[1], [0], [0], [1], [0, 0, 1, 1], [], []>} : vector<256x128xbf16>, vector<128x128xbf16>, vector<256x128xf32> -> vector<256x128xf32>
    %26 = arith.addf %22, %25 : vector<256x128xf32>
    %cst_17 = arith.constant 0.000000e+00 : f32
    %27 = vector.broadcast %cst_17 : f32 to vector<256x128xf32>
    %28 = arith.maximumf %26, %27 : vector<256x128xf32>
    %c0_18 = arith.constant 0 : index
    %c0_19 = arith.constant 0 : index
    %29 = vector.load %arg8[%c0_18, %c0_19] : memref<256x128xf32, #tpu.memory_space<vmem>>, vector<256x128xf32>
    tpu.vector_store %arg8[%c0_18, %c0_19], %28 {strides = array<i32>} : memref<256x128xf32, #tpu.memory_space<vmem>>, vector<256x128xf32>,
    return
  }
  func.func @transform_0(%arg0: i32) -> (i32, i32) {
    %c0_i32 = arith.constant 0 : i32
    %c0_i32_0 = arith.constant 0 : i32
    return %arg0, %c0_i32 : i32, i32
  }
  func.func @transform_1(%arg0: i32) -> (i32, i32) {
    %c0_i32 = arith.constant 0 : i32
    %c0_i32_0 = arith.constant 0 : i32
    %c0_i32_1 = arith.constant 0 : i32
    return %c0_i32, %c0_i32_0 : i32, i32
  }
  func.func @transform_2(%arg0: i32) -> (i32, i32) {
    %c0_i32 = arith.constant 0 : i32
    %c0_i32_0 = arith.constant 0 : i32
    %c0_i32_1 = arith.constant 0 : i32
    return %c0_i32, %c0_i32_0 : i32, i32
  }
  func.func @transform_3(%arg0: i32) -> (i32, i32) {
    %c0_i32 = arith.constant 0 : i32
    %c0_i32_0 = arith.constant 0 : i32
    %c0_i32_1 = arith.constant 0 : i32
    return %c0_i32, %c0_i32_0 : i32, i32
  }
  func.func @transform_4(%arg0: i32) -> (i32, i32) {
    %c0_i32 = arith.constant 0 : i32
    %c0_i32_0 = arith.constant 0 : i32
    %c0_i32_1 = arith.constant 0 : i32
    return %c0_i32, %c0_i32_0 : i32, i32
  }
  func.func @transform_5(%arg0: i32) -> (i32, i32) {
    %c0_i32 = arith.constant 0 : i32
    %c0_i32_0 = arith.constant 0 : i32
    return %arg0, %c0_i32 : i32, i32
  }
  func.func @transform_6(%arg0: i32) -> (i32, i32) {
    %c0_i32 = arith.constant 0 : i32
    %c0_i32_0 = arith.constant 0 : i32
    %c0_i32_1 = arith.constant 0 : i32
    return %c0_i32, %c0_i32_0 : i32, i32
  }
  func.func @transform_7(%arg0: i32) -> (i32, i32) {
    %c0_i32 = arith.constant 0 : i32
    %c0_i32_0 = arith.constant 0 : i32
    return %arg0, %c0_i32 : i32, i32
  }
}

</mosaic_0001>

<bundles_post_ra>
// kernel: resblock_forward.5
= control target key start
LH: loop header
LB: loop body
LE: loop exit
PB: predicated region body
PF: predicated region fallthrough
CT: control target
= control target key end

     0   :  { %s853_s18 = smov 0   ;;  %s1215_s0 = inlined_call_operand.vmem [shape: f32[512,128], index: 0, kind: input, shape index: {}]   ;;  %s1216_s1 = inlined_call_operand.vmem [shape: f32[1,128], index: 1, kind: input, shape index: {}]   ;;  %s1217_s2 = inlined_call_operand.vmem [shape: f32[1,128], index: 2, kind: input, shape index: {}]   ;;  %s1218_s3 = inlined_call_operand.vmem [shape: f32[1,128], index: 3, kind: input, shape index: {}]   ;;  %s1219_s4 = inlined_call_operand.vmem [shape: f32[1,128], index: 4, kind: input, shape index: {}]   ;;  %s1220_s5 = inlined_call_operand.vmem [shape: bf16[512,128], index: 5, kind: output, shape index: {}]  }
   0x1 LB: > { %s634_s19 = sadd.s32 4294967295, %s821_s18   ;;  %p638_p0 = scmp.ge.s32.totalorder %s821_s18, 1  ;;  %s821_s18 = sphi %s853_s18, %s15_s18  }
   0x2   : > { %p188_p1 = scmp.lt.s32.totalorder %s821_s18, 3 }
   0x4   : > { %p189_p2 = pnand %p638_p0, %p188_p1 }
   0x5   : > { %s639_s20 = sshll.u32 (!%p189_p2), %s634_s19, 5  ;;  %v228_v0 = vld [vmem:[%s1216_s1] sm:$0x1] (!%p189_p2)  ;;  %v272_v4 = vlaneseq (!%p189_p2) }
   0x6   : > { %192 = sbr.rel (%p189_p2) target bundleno = 66 (0x42), region = 40  ;;  %v230_v1 = vld [vmem:[%s1217_s2] sm:$0x1] (!%p189_p2)  ;;  %p217_p3 = scmp.lt.s32.totalorder (!%p189_p2), %s639_s20, 63  ;;  %v229_v2 = vmul.f32 (!%p189_p2), 0.001953125, %v228_v0 }
   0x7   : > { %v231_v3 = vmul.f32 (!%p189_p2), 0.001953125, %v230_v1  ;;  %v869_v7 = vshrl.u32 (!%p189_p2), %v272_v4, 7  ;;  %v237_v26 = vld [vmem:[%s1218_s3] sm:$0x1] (!%p189_p2) }
   0x8   : > { %v232_v5 = vmul.f32 (!%p189_p2), %v229_v2, %v229_v2 }
   0x9   : > { %v274_v10 = vsub.s32 (!%p189_p2), 0, %v869_v7 }
   0xa   : > { %v233_v6 = vsub.f32 (!%p189_p2), %v231_v3, %v232_v5 }
   0xb   : > { %v886_v13 = vrot.slane (!%p189_p2), %v229_v2, %v274_v10 }
   0xc   : > { %v234_v8 = vmax.f32 (!%p189_p2), %v233_v6, 0.0 }
   0xd   : > { %s1229_s20 = smov (!%p217_p3, %s639_s20), 63 }
   0xe   : > { %s640_s25 = sshll.u32 %s1229_s20, 3  ;;  %v235_v9 = vadd.f32 1e-05, %v234_v8  ;;  %s642_s8 = sshll.u32 %s1229_s20, 2 }
   0xf   : > { %s875_s28 = scalar_lea.vmem %s1215_s0, %s640_s25  ;;  %s1074_s11 = scalar_lea.vmem %s1220_s5, %s642_s8 }
  0x10   : > { %813 = vrsqrt.f32 %v235_v9  ;;  %v879_v11 = vld [vmem:[%s875_s28] sm:$0xff]  ;;  %v882_v12 = vld [vmem:[%s875_s28 + $0x8] sm:$0xff]  ;;  %v889_v14 = vld [vmem:[%s875_s28 + $0x10] sm:$0xff] }
  0x11   : > { %v892_v15 = vld [vmem:[%s875_s28 + $0x18] sm:$0xff]  ;;  %v895_v16 = vld [vmem:[%s875_s28 + $0x20] sm:$0xff]  ;;  %v898_v17 = vld [vmem:[%s875_s28 + $0x28] sm:$0xff]  ;;  %v277_v27 = vsub.f32 %v879_v11, %v886_v13  ;;  %v278_v28 = vsub.f32 %v882_v12, %v886_v13  ;;  %v279_v32 = vsub.f32 %v889_v14, %v886_v13 }
  0x12   : > { %v901_v18 = vld [vmem:[%s875_s28 + $0x30] sm:$0xff]  ;;  %v904_v19 = vld [vmem:[%s875_s28 + $0x38] sm:$0xff]  ;;  %v907_v20 = vld [vmem:[%s875_s28 + $0x40] sm:$0xff]  ;;  %v280_v33 = vsub.f32 %v892_v15, %v886_v13  ;;  %v281_v34 = vsub.f32 %v895_v16, %v886_v13  ;;  %v282_v35 = vsub.f32 %v898_v17, %v886_v13 }
  0x13   : > { %v910_v21 = vld [vmem:[%s875_s28 + $0x48] sm:$0xff]  ;;  %v913_v22 = vld [vmem:[%s875_s28 + $0x50] sm:$0xff]  ;;  %v916_v23 = vld [vmem:[%s875_s28 + $0x58] sm:$0xff]  ;;  %v283_v39 = vsub.f32 %v901_v18, %v886_v13  ;;  %v284_v40 = vsub.f32 %v904_v19, %v886_v13  ;;  %v285_v41 = vsub.f32 %v907_v20, %v886_v13 }
  0x14   : > { %v919_v24 = vld [vmem:[%s875_s28 + $0x60] sm:$0xff]  ;;  %v922_v25 = vld [vmem:[%s875_s28 + $0x68] sm:$0xff]  ;;  %v932_v29 = vld [vmem:[%s875_s28 + $0x70] sm:$0xff]  ;;  %v286_v42 = vsub.f32 %v910_v21, %v886_v13  ;;  %v287_v46 = vsub.f32 %v913_v22, %v886_v13  ;;  %v288_v47 = vsub.f32 %v916_v23, %v886_v13 }
  0x15   : > { %v935_v30 = vld [vmem:[%s875_s28 + $0x78] sm:$0xff]  ;;  %v938_v31 = vld [vmem:[%s875_s28 + $0x80] sm:$0xff]  ;;  %v949_v36 = vld [vmem:[%s875_s28 + $0x88] sm:$0xff]  ;;  %v289_v48 = vsub.f32 %v919_v24, %v886_v13  ;;  %v290_v49 = vsub.f32 %v922_v25, %v886_v13  ;;  %v291_v54 = vsub.f32 %v932_v29, %v886_v13 }
  0x16   : > { %v952_v37 = vld [vmem:[%s875_s28 + $0x90] sm:$0xff]  ;;  %v955_v38 = vld [vmem:[%s875_s28 + $0x98] sm:$0xff]  ;;  %v966_v43 = vld [vmem:[%s875_s28 + $0xa0] sm:$0xff]  ;;  %v292_v55 = vsub.f32 %v935_v30, %v886_v13  ;;  %v293_v56 = vsub.f32 %v938_v31, %v886_v13  ;;  %v294_v57 = vsub.f32 %v949_v36, %v886_v13 }
  0x17   : > { %v969_v44 = vld [vmem:[%s875_s28 + $0xa8] sm:$0xff]  ;;  %v972_v45 = vld [vmem:[%s875_s28 + $0xb0] sm:$0xff]  ;;  %v983_v50 = vld [vmem:[%s875_s28 + $0xb8] sm:$0xff]  ;;  %v295_v62 = vsub.f32 %v952_v37, %v886_v13  ;;  %v296_v63 = vsub.f32 %v955_v38, %v886_v13  ;;  %v297_v0 = vsub.f32 %v966_v43, %v886_v13 }
  0x18   : > { %v986_v51 = vld [vmem:[%s875_s28 + $0xc0] sm:$0xff]  ;;  %v989_v52 = vld [vmem:[%s875_s28 + $0xc8] sm:$0xff]  ;;  %v1000_v58 = vld [vmem:[%s875_s28 + $0xd0] sm:$0xff]  ;;  %v298_v4 = vsub.f32 %v969_v44, %v886_v13  ;;  %v299_v5 = vsub.f32 %v972_v45, %v886_v13  ;;  %v300_v6 = vsub.f32 %v983_v50, %v886_v13 }
  0x19   : > { %v1003_v59 = vld [vmem:[%s875_s28 + $0xd8] sm:$0xff]  ;;  %v1006_v60 = vld [vmem:[%s875_s28 + $0xe0] sm:$0xff]  ;;  %v1015_v1 = vld [vmem:[%s875_s28 + $0xe8] sm:$0xff]  ;;  %v301_v8 = vsub.f32 %v986_v51, %v886_v13 }
  0x1a   : > { %v814_v53 = vpop.eup %813  ;;  %v1018_v2 = vld [vmem:[%s875_s28 + $0xf0] sm:$0xff]  ;;  %v1021_v3 = vld [vmem:[%s875_s28 + $0xf8] sm:$0xff]  ;;  %v1044_v15 = vld [vmem:[%s1219_s4] ss:$0 sm:$0xff] }
  0x1b   : > { %v238_v61 = vmul.f32 %v814_v53, %v237_v26 }
  0x1d   : > { %v1033_v9 = vrot.slane %v238_v61, %v274_v10 }
  0x1f   : > { %v315_v18 = vmul.f32 %v1033_v9, %v277_v27  ;;  %v316_v19 = vmul.f32 %v1033_v9, %v278_v28  ;;  %v317_v26 = vmul.f32 %v1033_v9, %v279_v32  ;;  %v318_v53 = vmul.f32 %v1033_v9, %v280_v33 }
  0x20   : > { %v319_v61 = vmul.f32 %v1033_v9, %v281_v34  ;;  %v320_v7 = vmul.f32 %v1033_v9, %v282_v35  ;;  %v321_v10 = vmul.f32 %v1033_v9, %v283_v39  ;;  %v322_v14 = vmul.f32 %v1033_v9, %v284_v40 }
  0x21   : > { %v354_v16 = vadd.f32 %v1044_v15, %v315_v18  ;;  %v355_v17 = vadd.f32 %v1044_v15, %v316_v19  ;;  %v356_v27 = vadd.f32 %v1044_v15, %v317_v26  ;;  %v357_v28 = vadd.f32 %v1044_v15, %v318_v53 }
  0x22   : > { %v358_v32 = vadd.f32 %v1044_v15, %v319_v61  ;;  %v359_v33 = vadd.f32 %v1044_v15, %v320_v7  ;;  %v360_v34 = vadd.f32 %v1044_v15, %v321_v10  ;;  %v361_v35 = vadd.f32 %v1044_v15, %v322_v14 }
  0x23   : > { %v386_v39 = vmax.f32 %v354_v16, 0.0  ;;  %v387_v12 = vmax.f32 %v355_v17, 0.0  ;;  %v388_v40 = vmax.f32 %v356_v27, 0.0  ;;  %v389_v11 = vmax.f32 %v357_v28, 0.0 }
  0x24   : > { %v390_v18 = vmax.f32 %v358_v32, 0.0  ;;  %v391_v19 = vmax.f32 %v359_v33, 0.0  ;;  %v392_v26 = vmax.f32 %v360_v34, 0.0  ;;  %v393_v7 = vmax.f32 %v361_v35, 0.0 }
  0x25   : > { %v713_v10 = vpack.c.bf16 %v387_v12, %v386_v39  ;;  %v718_v53 = vpack.c.bf16 %v389_v11, %v388_v40  ;;  %v323_v14 = vmul.f32 %v1033_v9, %v285_v41  ;;  %v324_v16 = vmul.f32 %v1033_v9, %v286_v42 }
  0x26   : > { %v723_v17 = vpack.c.bf16 %v391_v19, %v390_v18  ;;  %v728_v61 = vpack.c.bf16 %v393_v7, %v392_v26  ;;  %v325_v27 = vmul.f32 %v1033_v9, %v287_v46  ;;  %v326_v11 = vmul.f32 %v1033_v9, %v288_v47 }
  0x27   : > { %714 = vst [vmem:[%s1074_s11] sm:$0xff] %v713_v10   ;;  %790 = vst [vmem:[%s1074_s11 + $0x8] sm:$0xff] %v718_v53   ;;  %v362_v20 = vadd.f32 %v1044_v15, %v323_v14  ;;  %v363_v21 = vadd.f32 %v1044_v15, %v324_v16  ;;  %v327_v41 = vmul.f32 %v1033_v9, %v289_v48 }
  0x28   : > { %v328_v22 = vmul.f32 %v1033_v9, %v290_v49  ;;  %791 = vst [vmem:[%s1074_s11 + $0x10] sm:$0xff] %v723_v17   ;;  %792 = vst [vmem:[%s1074_s11 + $0x18] sm:$0xff] %v728_v61   ;;  %v364_v23 = vadd.f32 %v1044_v15, %v325_v27  ;;  %v365_v42 = vadd.f32 %v1044_v15, %v326_v11 }
  0x29   : > { %v329_v46 = vmul.f32 %v1033_v9, %v291_v54  ;;  %v330_v24 = vmul.f32 %v1033_v9, %v292_v55  ;;  %v394_v47 = vmax.f32 %v362_v20, 0.0  ;;  %v395_v25 = vmax.f32 %v363_v21, 0.0 }
  0x2a   : > { %v366_v48 = vadd.f32 %v1044_v15, %v327_v41  ;;  %v367_v49 = vadd.f32 %v1044_v15, %v328_v22  ;;  %v396_v12 = vmax.f32 %v364_v23, 0.0  ;;  %v397_v28 = vmax.f32 %v365_v42, 0.0 }
  0x2b   : > { %v368_v32 = vadd.f32 %v1044_v15, %v329_v46  ;;  %v369_v29 = vadd.f32 %v1044_v15, %v330_v24  ;;  %v733_v54 = vpack.c.bf16 %v395_v25, %v394_v47  ;;  %v331_v30 = vmul.f32 %v1033_v9, %v293_v56 }
  0x2c   : > { %v398_v33 = vmax.f32 %v366_v48, 0.0  ;;  %v399_v34 = vmax.f32 %v367_v49, 0.0  ;;  %v738_v55 = vpack.c.bf16 %v397_v28, %v396_v12  ;;  %v332_v40 = vmul.f32 %v1033_v9, %v294_v57 }
  0x2d   : > { %v400_v35 = vmax.f32 %v368_v32, 0.0  ;;  %v401_v39 = vmax.f32 %v369_v29, 0.0  ;;  %793 = vst [vmem:[%s1074_s11 + $0x20] sm:$0xff] %v733_v54   ;;  %v370_v19 = vadd.f32 %v1044_v15, %v331_v30  ;;  %v333_v31 = vmul.f32 %v1033_v9, %v295_v62 }
  0x2e   : > { %v743_v18 = vpack.c.bf16 %v399_v34, %v398_v33  ;;  %v334_v56 = vmul.f32 %v1033_v9, %v296_v63  ;;  %794 = vst [vmem:[%s1074_s11 + $0x28] sm:$0xff] %v738_v55   ;;  %v371_v36 = vadd.f32 %v1044_v15, %v332_v40  ;;  %v335_v57 = vmul.f32 %v1033_v9, %v297_v0 }
  0x2f   : > { %v748_v26 = vpack.c.bf16 %v401_v39, %v400_v35  ;;  %v336_v37 = vmul.f32 %v1033_v9, %v298_v4  ;;  %v402_v62 = vmax.f32 %v370_v19, 0.0  ;;  %v372_v38 = vadd.f32 %v1044_v15, %v333_v31 }
  0x30   : > { %795 = vst [vmem:[%s1074_s11 + $0x30] sm:$0xff] %v743_v18   ;;  %v373_v63 = vadd.f32 %v1044_v15, %v334_v56  ;;  %v337_v7 = vmul.f32 %v1033_v9, %v299_v5  ;;  %v403_v43 = vmax.f32 %v371_v36, 0.0  ;;  %v374_v0 = vadd.f32 %v1044_v15, %v335_v57 }
  0x31   : > { %796 = vst [vmem:[%s1074_s11 + $0x38] sm:$0xff] %v748_v26   ;;  %v375_v44 = vadd.f32 %v1044_v15, %v336_v37  ;;  %v338_v4 = vmul.f32 %v1033_v9, %v300_v6  ;;  %v404_v10 = vmax.f32 %v372_v38, 0.0  ;;  %v339_v45 = vmul.f32 %v1033_v9, %v301_v8 }
  0x32   : > { %v405_v53 = vmax.f32 %v373_v63, 0.0  ;;  %v376_v14 = vadd.f32 %v1044_v15, %v337_v7  ;;  %v753_v5 = vpack.c.bf16 %v403_v43, %v402_v62  ;;  %v406_v16 = vmax.f32 %v374_v0, 0.0 }
  0x33   : > { %v407_v17 = vmax.f32 %v375_v44, 0.0  ;;  %v377_v61 = vadd.f32 %v1044_v15, %v338_v4  ;;  %v1221_v6 = vsub.f32 %v989_v52, %v886_v13  ;;  %v378_v20 = vadd.f32 %v1044_v15, %v339_v45 }
  0x34   : > { %v758_v27 = vpack.c.bf16 %v405_v53, %v404_v10  ;;  %v408_v50 = vmax.f32 %v376_v14, 0.0  ;;  %797 = vst [vmem:[%s1074_s11 + $0x40] sm:$0xff] %v753_v5   ;;  %v1222_v8 = vsub.f32 %v1000_v58, %v886_v13  ;;  %v1223_v22 = vsub.f32 %v1003_v59, %v886_v13 }
  0x35   : > { %v340_v11 = vmul.f32 %v1033_v9, %v1221_v6  ;;  %v763_v21 = vpack.c.bf16 %v407_v17, %v406_v16  ;;  %v409_v51 = vmax.f32 %v377_v61, 0.0  ;;  %v410_v42 = vmax.f32 %v378_v20, 0.0 }
  0x36   : > { %v341_v41 = vmul.f32 %v1033_v9, %v1222_v8  ;;  %v342_v23 = vmul.f32 %v1033_v9, %v1223_v22  ;;  %798 = vst [vmem:[%s1074_s11 + $0x48] sm:$0xff] %v758_v27   ;;  %v1224_v46 = vsub.f32 %v1006_v60, %v886_v13  ;;  %v1225_v58 = vsub.f32 %v1015_v1, %v886_v13 }
  0x37   : > { %v379_v52 = vadd.f32 %v1044_v15, %v340_v11  ;;  %799 = vst [vmem:[%s1074_s11 + $0x50] sm:$0xff] %v763_v21   ;;  %v768_v25 = vpack.c.bf16 %v409_v51, %v408_v50  ;;  %v1226_v49 = vsub.f32 %v1018_v2, %v886_v13  ;;  %v1227_v32 = vsub.f32 %v1021_v3, %v886_v13 }
  0x38   : > { %v343_v24 = vmul.f32 %v1033_v9, %v1224_v46  ;;  %v344_v47 = vmul.f32 %v1033_v9, %v1225_v58  ;;  %v380_v59 = vadd.f32 %v1044_v15, %v341_v41  ;;  %v381_v48 = vadd.f32 %v1044_v15, %v342_v23 }
  0x39   : > { %v345_v12 = vmul.f32 %v1033_v9, %v1226_v49  ;;  %v411_v60 = vmax.f32 %v379_v52, 0.0  ;;  %v346_v29 = vmul.f32 %v1033_v9, %v1227_v32  ;;  %800 = vst [vmem:[%s1074_s11 + $0x58] sm:$0xff] %v768_v25  }
  0x3a   : > { %v382_v28 = vadd.f32 %v1044_v15, %v343_v24  ;;  %v383_v1 = vadd.f32 %v1044_v15, %v344_v47  ;;  %v412_v54 = vmax.f32 %v380_v59, 0.0  ;;  %v413_v33 = vmax.f32 %v381_v48, 0.0 }
  0x3b   : > { %v384_v2 = vadd.f32 %v1044_v15, %v345_v12  ;;  %v773_v34 = vpack.c.bf16 %v411_v60, %v410_v42  ;;  %v385_v35 = vadd.f32 %v1044_v15, %v346_v29 }
  0x3c   : > { %v414_v30 = vmax.f32 %v382_v28, 0.0  ;;  %v415_v55 = vmax.f32 %v383_v1, 0.0  ;;  %v778_v39 = vpack.c.bf16 %v413_v33, %v412_v54 }
  0x3d   : > { %v416_v40 = vmax.f32 %v384_v2, 0.0  ;;  %801 = vst [vmem:[%s1074_s11 + $0x60] sm:$0xff] %v773_v34   ;;  %v417_v19 = vmax.f32 %v385_v35, 0.0 }
  0x3e   : > { %v783_v18 = vpack.c.bf16 %v415_v55, %v414_v30  ;;  %802 = vst [vmem:[%s1074_s11 + $0x68] sm:$0xff] %v778_v39  }
  0x3f   : > { %v788_v13 = vpack.c.bf16 %v417_v19, %v416_v40 }
  0x40   : > { %803 = vst [vmem:[%s1074_s11 + $0x70] sm:$0xff] %v783_v18  }
  0x41   : > { %804 = vst [vmem:[%s1074_s11 + $0x78] sm:$0xff] %v788_v13  }
  0x42 PF: > { %s15_s18 = sadd.s32 1, %s821_s18  }
  0x43   : > { %p12_p4 = scmp.ge.s32.totalorder %s15_s18, 4  }
  0x45   :  { %14 = sbr.rel (!%p12_p4) target bundleno = 1 (0x1), region = 70 }

// kernel: resblock_forward.4
= control target key start
LH: loop header
LB: loop body
LE: loop exit
PB: predicated region body
PF: predicated region fallthrough
CT: control target
= control target key end

     0   :  { %s959_s15 = smov 0   ;;  %s1148_s0 = inlined_call_operand.vmem [shape: bf16[512,128], index: 0, kind: input, shape index: {}]   ;;  %s1149_s1 = inlined_call_operand.vmem [shape: bf16[128,128], index: 1, kind: input, shape index: {}]   ;;  %s1150_s2 = inlined_call_operand.vmem [shape: f32[512,128], index: 2, kind: output, shape index: {0}]   ;;  %s1151_s3 = inlined_call_operand.vmem [shape: f32[1,128], index: 3, kind: output, shape index: {1}]   ;;  %s1152_s4 = inlined_call_operand.vmem [shape: f32[1,128], index: 4, kind: output, shape index: {2}]  }
   0x1 LB: > { %s768_s16 = sadd.s32 4294967295, %s931_s15   ;;  %p772_p0 = scmp.ge.s32.totalorder %s931_s15, 1  ;;  %s931_s15 = sphi %s959_s15, %s15_s15  }
   0x2   : > { %p158_p1 = scmp.lt.s32.totalorder %s931_s15, 3 }
   0x4   : > { %p159_p2 = pnand %p772_p0, %p158_p1 }
   0x5   : > { %s773_s17 = sshll.u32 (!%p159_p2), %s768_s16, 5  ;;  %p777_p4 = scmp.ne.s32.totalorder (!%p159_p2), %s768_s16, 0 }
   0x6   : > { %162 = sbr.rel (%p159_p2) target bundleno = 347 (0x15b), region = 28  ;;  %p185_p3 = scmp.lt.s32.totalorder (!%p159_p2), %s773_s17, 63 }
   0xd   : > { %s1154_s17 = smov (!%p185_p3, %s773_s17), 63  ;;  %200 = sbr.rel (%p777_p4) target bundleno = 20 (0x14), region = 32 }
   0xe   : > { %s774_s18 = sshll.u32 %s1154_s17, 2  ;;  %s776_s19 = sshll.u32 %s1154_s17, 3  ;;  %v933_v0 = vmov (!%p777_p4), 0.0  }
   0xf   : > { %s970_s22 = scalar_lea.vmem %s1148_s0, %s774_s18  ;;  %s975_s25 = scalar_lea.vmem %s1150_s2, %s776_s19  ;;  %201 = vst [vmem:[%s1151_s3] sm:$0x1] (!%p777_p4), %v933_v0  ;;  %202 = vst [vmem:[%s1152_s4] sm:$0x1] (!%p777_p4), %v933_v0 }
  0x14 PF: > { %v901_v1 = vld [vmem:[%s1149_s1] sm:$0xff]   ;;  %v902_v2 = vld [vmem:[%s1149_s1 + $0x8] sm:$0xff]   ;;  %v903_v3 = vld [vmem:[%s1149_s1 + $0x10] sm:$0xff]  }
  0x15   : > { %828 = vmatprep.subr.bf16.mxu0 %v901_v1  ;;  %876 = vmatprep.subr.bf16.mxu1 %v901_v1  ;;  %v904_v4 = vld [vmem:[%s1149_s1 + $0x18] sm:$0xff]   ;;  %v909_v5 = vld [vmem:[%s970_s22] sm:$0xff]   ;;  %v906_v7 = vld [vmem:[%s1149_s1 + $0x28] sm:$0xff]  }
  0x16   : > { %829 = vmatpush3.bf16.msra.mxu0 %v901_v1  ;;  %884 = vmatpush3.bf16.msra.mxu1 %v901_v1  ;;  %v905_v6 = vld [vmem:[%s1149_s1 + $0x20] sm:$0xff]   ;;  %v907_v9 = vld [vmem:[%s1149_s1 + $0x30] sm:$0xff]   ;;  %v908_v10 = vld [vmem:[%s1149_s1 + $0x38] sm:$0xff]  }
  0x17   : > { %830 = vmatprep.subr.bf16.mxu0 %v902_v2  ;;  %877 = vmatprep.subr.bf16.mxu1 %v902_v2  ;;  %v917_v8 = vld [vmem:[%s970_s22 + $0x40] sm:$0xff]   ;;  %v910_v11 = vld [vmem:[%s970_s22 + $0x8] sm:$0xff]   ;;  %v911_v13 = vld [vmem:[%s970_s22 + $0x10] sm:$0xff]  }
  0x18   : > { %844 = vmatprep.mubr.bf16.mxu0 %v909_v5  ;;  %860 = vmatprep.mubr.bf16.mxu1 %v917_v8  ;;  %v918_v12 = vld [vmem:[%s970_s22 + $0x48] sm:$0xff]   ;;  %v919_v14 = vld [vmem:[%s970_s22 + $0x50] sm:$0xff]   ;;  %v912_v15 = vld [vmem:[%s970_s22 + $0x18] sm:$0xff]  }
  0x19   : > { %v920_v16 = vld [vmem:[%s970_s22 + $0x58] sm:$0xff]   ;;  %v913_v17 = vld [vmem:[%s970_s22 + $0x20] sm:$0xff]   ;;  %v914_v19 = vld [vmem:[%s970_s22 + $0x28] sm:$0xff]  }
  0x1a   : > { %831 = vmatpush3.bf16.msra.mxu0 %v902_v2  ;;  %885 = vmatpush3.bf16.msra.mxu1 %v902_v2  ;;  %v921_v18 = vld [vmem:[%s970_s22 + $0x60] sm:$0xff]   ;;  %v922_v20 = vld [vmem:[%s970_s22 + $0x68] sm:$0xff]   ;;  %v915_v21 = vld [vmem:[%s970_s22 + $0x30] sm:$0xff]  }
  0x1b   : > { %832 = vmatprep.subr.bf16.mxu0 %v903_v3  ;;  %878 = vmatprep.subr.bf16.mxu1 %v903_v3  ;;  %v923_v22 = vld [vmem:[%s970_s22 + $0x70] sm:$0xff]   ;;  %v916_v23 = vld [vmem:[%s970_s22 + $0x38] sm:$0xff]  }
  0x1c   : > { %v924_v24 = vld [vmem:[%s970_s22 + $0x78] sm:$0xff]  }
  0x1e   : > { %833 = vmatpush3.bf16.msra.mxu0 %v903_v3  ;;  %886 = vmatpush3.bf16.msra.mxu1 %v903_v3 }
  0x1f   : > { %834 = vmatprep.subr.bf16.mxu0 %v904_v4  ;;  %879 = vmatprep.subr.bf16.mxu1 %v904_v4 }
  0x22   : > { %835 = vmatpush3.bf16.msra.mxu0 %v904_v4  ;;  %887 = vmatpush3.bf16.msra.mxu1 %v904_v4 }
  0x23   : > { %836 = vmatprep.subr.bf16.mxu0 %v905_v6  ;;  %880 = vmatprep.subr.bf16.mxu1 %v905_v6 }
  0x26   : > { %837 = vmatpush3.bf16.msra.mxu0 %v905_v6  ;;  %888 = vmatpush3.bf16.msra.mxu1 %v905_v6 }
  0x27   : > { %838 = vmatprep.subr.bf16.mxu0 %v906_v7  ;;  %881 = vmatprep.subr.bf16.mxu1 %v906_v7 }
  0x2a   : > { %839 = vmatpush3.bf16.msra.mxu0 %v906_v7  ;;  %889 = vmatpush3.bf16.msra.mxu1 %v906_v7 }
  0x2b   : > { %840 = vmatprep.subr.bf16.mxu0 %v907_v9  ;;  %882 = vmatprep.subr.bf16.mxu1 %v907_v9 }
  0x2e   : > { %841 = vmatpush3.bf16.msra.mxu0 %v907_v9  ;;  %890 = vmatpush3.bf16.msra.mxu1 %v907_v9 }
  0x2f   : > { %842 = vmatprep.subr.bf16.mxu0 %v908_v10  ;;  %883 = vmatprep.subr.bf16.mxu1 %v908_v10 }
  0x32   : > { %843 = vmatpush3.bf16.msra.mxu0 %v908_v10  ;;  %891 = vmatpush3.bf16.msra.mxu1 %v908_v10 }
  0x35   : > { %845 = vmatmul.mubr.bf16.vlgmr.msra.gmra.mrb[0].mxu0 %v910_v11  ;;  %861 = vmatmul.mubr.bf16.vlgmr.msra.gmra.mrb[0].mxu1 %v918_v12 }
  0x36   : > { %848 = vmatprep.mubr.bf16.mxu0 %v911_v13  ;;  %864 = vmatprep.mubr.bf16.mxu1 %v919_v14 }
  0x3d   : > { %849 = vmatmul.mubr.bf16.gmra.mrb[4].mxu0 %v912_v15  ;;  %865 = vmatmul.mubr.bf16.gmra.mrb[4].mxu1 %v920_v16 }
  0x3e   : > { %852 = vmatprep.mubr.bf16.mxu0 %v913_v17  ;;  %868 = vmatprep.mubr.bf16.mxu1 %v921_v18 }
  0x45   : > { %853 = vmatmul.mubr.bf16.gmra.mrb[8].mxu0 %v914_v19  ;;  %869 = vmatmul.mubr.bf16.gmra.mrb[8].mxu1 %v922_v20 }
  0x46   : > { %856 = vmatprep.mubr.bf16.mxu0 %v915_v21  ;;  %872 = vmatprep.mubr.bf16.mxu1 %v923_v22 }
  0x4d   : > { %857 = vmatmul.mubr.bf16.gmra.mrb[12].mxu0 %v916_v23  ;;  %873 = vmatmul.mubr.bf16.gmra.mrb[12].mxu1 %v924_v24 }
 0x108   : > { %v846_v25 = vpop.f32.mrb[0].mxu0  ;;  %v1023_v26 = vpop.f32.mrb[0].mxu1 }
 0x109   : > { %558 = vst [vmem:[%s975_s25 + $0x10] sm:$0xff] %v846_v25  ;;  %v429_v27 = vpop.f32.mrb[1].mxu0  ;;  %574 = vst [vmem:[%s975_s25 + $0x90] sm:$0xff] %v1023_v26  ;;  %v1028_v28 = vpop.f32.mrb[1].mxu1  ;;  %v631_v36 = vmul.f32 %v846_v25, %v846_v25 }
 0x10a   : > { %556 = vst [vmem:[%s975_s25] sm:$0xff] %v429_v27  ;;  %v847_v29 = vpop.f32.mrb[2].mxu0  ;;  %572 = vst [vmem:[%s975_s25 + $0x80] sm:$0xff] %v1028_v28  ;;  %v1033_v30 = vpop.f32.mrb[2].mxu1  ;;  %v629_v33 = vmul.f32 %v429_v27, %v429_v27 }
 0x10b   : > { %559 = vst [vmem:[%s975_s25 + $0x18] sm:$0xff] %v847_v29  ;;  %v432_v31 = vpop.f32.mrb[3].mxu0  ;;  %575 = vst [vmem:[%s975_s25 + $0x98] sm:$0xff] %v1033_v30  ;;  %v1038_v32 = vpop.f32.mrb[3].mxu1  ;;  %v632_v39 = vmul.f32 %v847_v29, %v847_v29 }
 0x10c   : > { %557 = vst [vmem:[%s975_s25 + $0x8] sm:$0xff] %v432_v31  ;;  %v589_v34 = vadd.f32 %v432_v31, %v429_v27  ;;  %v630_v35 = vmul.f32 %v432_v31, %v432_v31  ;;  %573 = vst [vmem:[%s975_s25 + $0x88] sm:$0xff] %v1038_v32 }
 0x10e   : > { %v590_v37 = vadd.f32 %v846_v25, %v589_v34  ;;  %v661_v38 = vadd.f32 %v630_v35, %v629_v33 }
 0x110   : > { %v662_v40 = vadd.f32 %v661_v38, %v631_v36  ;;  %v850_v41 = vpop.f32.mrb[4].mxu0  ;;  %v591_v42 = vadd.f32 %v847_v29, %v590_v37  ;;  %v1043_v43 = vpop.f32.mrb[4].mxu1 }
 0x111   : > { %562 = vst [vmem:[%s975_s25 + $0x30] sm:$0xff] %v850_v41  ;;  %v445_v44 = vpop.f32.mrb[5].mxu0  ;;  %578 = vst [vmem:[%s975_s25 + $0xb0] sm:$0xff] %v1043_v43  ;;  %v1048_v45 = vpop.f32.mrb[5].mxu1  ;;  %v635_v56 = vmul.f32 %v850_v41, %v850_v41 }
 0x112   : > { %560 = vst [vmem:[%s975_s25 + $0x20] sm:$0xff] %v445_v44  ;;  %v592_v46 = vadd.f32 %v591_v42, %v445_v44  ;;  %v633_v47 = vmul.f32 %v445_v44, %v445_v44  ;;  %v663_v48 = vadd.f32 %v662_v40, %v632_v39  ;;  %v851_v49 = vpop.f32.mrb[6].mxu0  ;;  %576 = vst [vmem:[%s975_s25 + $0xa0] sm:$0xff] %v1048_v45  ;;  %v1053_v50 = vpop.f32.mrb[6].mxu1 }
 0x113   : > { %563 = vst [vmem:[%s975_s25 + $0x38] sm:$0xff] %v851_v49  ;;  %v448_v51 = vpop.f32.mrb[7].mxu0  ;;  %579 = vst [vmem:[%s975_s25 + $0xb8] sm:$0xff] %v1053_v50  ;;  %v1058_v52 = vpop.f32.mrb[7].mxu1  ;;  %v636_v59 = vmul.f32 %v851_v49, %v851_v49  ;;  %v645_v42 = vmul.f32 %v1028_v28, %v1028_v28 }
 0x114   : > { %v664_v53 = vadd.f32 %v663_v48, %v633_v47  ;;  %561 = vst [vmem:[%s975_s25 + $0x28] sm:$0xff] %v448_v51  ;;  %v593_v54 = vadd.f32 %v592_v46, %v448_v51  ;;  %v634_v55 = vmul.f32 %v448_v51, %v448_v51  ;;  %577 = vst [vmem:[%s975_s25 + $0xa8] sm:$0xff] %v1058_v52 }
 0x115   : > { %v647_v51 = vmul.f32 %v1023_v26, %v1023_v26 }
 0x116   : > { %v594_v57 = vadd.f32 %v850_v41, %v593_v54  ;;  %v665_v58 = vadd.f32 %v664_v53, %v634_v55  ;;  %v648_v55 = vmul.f32 %v1033_v30, %v1033_v30 }
 0x118   : > { %v666_v60 = vadd.f32 %v665_v58, %v635_v56  ;;  %v854_v61 = vpop.f32.mrb[8].mxu0  ;;  %v595_v62 = vadd.f32 %v851_v49, %v594_v57  ;;  %v1063_v63 = vpop.f32.mrb[8].mxu1  ;;  %v646_v49 = vmul.f32 %v1038_v32, %v1038_v32 }
 0x119   : > { %566 = vst [vmem:[%s975_s25 + $0x50] sm:$0xff] %v854_v61  ;;  %v461_v0 = vpop.f32.mrb[9].mxu0  ;;  %582 = vst [vmem:[%s975_s25 + $0xd0] sm:$0xff] %v1063_v63  ;;  %v1068_v1 = vpop.f32.mrb[9].mxu1  ;;  %v639_v12 = vmul.f32 %v854_v61, %v854_v61 }
 0x11a   : > { %564 = vst [vmem:[%s975_s25 + $0x40] sm:$0xff] %v461_v0  ;;  %v596_v2 = vadd.f32 %v595_v62, %v461_v0  ;;  %v637_v3 = vmul.f32 %v461_v0, %v461_v0  ;;  %v667_v4 = vadd.f32 %v666_v60, %v636_v59  ;;  %v855_v5 = vpop.f32.mrb[10].mxu0  ;;  %580 = vst [vmem:[%s975_s25 + $0xc0] sm:$0xff] %v1068_v1  ;;  %v1073_v6 = vpop.f32.mrb[10].mxu1 }
 0x11b   : > { %567 = vst [vmem:[%s975_s25 + $0x58] sm:$0xff] %v855_v5  ;;  %v464_v7 = vpop.f32.mrb[11].mxu0  ;;  %583 = vst [vmem:[%s975_s25 + $0xd8] sm:$0xff] %v1073_v6  ;;  %v1078_v8 = vpop.f32.mrb[11].mxu1  ;;  %v640_v15 = vmul.f32 %v855_v5, %v855_v5 }
 0x11c   : > { %v668_v9 = vadd.f32 %v667_v4, %v637_v3  ;;  %565 = vst [vmem:[%s975_s25 + $0x48] sm:$0xff] %v464_v7  ;;  %v597_v10 = vadd.f32 %v596_v2, %v464_v7  ;;  %v638_v11 = vmul.f32 %v464_v7, %v464_v7  ;;  %581 = vst [vmem:[%s975_s25 + $0xc8] sm:$0xff] %v1078_v8 }
 0x11e   : > { %v598_v13 = vadd.f32 %v854_v61, %v597_v10  ;;  %v669_v14 = vadd.f32 %v668_v9, %v638_v11  ;;  %v650_v61 = vmul.f32 %v1058_v52, %v1058_v52  ;;  %v654_v9 = vmul.f32 %v1078_v8, %v1078_v8 }
 0x120   : > { %v670_v16 = vadd.f32 %v669_v14, %v639_v12  ;;  %v858_v17 = vpop.f32.mrb[12].mxu0  ;;  %v599_v18 = vadd.f32 %v855_v5, %v598_v13  ;;  %v1083_v19 = vpop.f32.mrb[12].mxu1 }
 0x121   : > { %570 = vst [vmem:[%s975_s25 + $0x70] sm:$0xff] %v858_v17  ;;  %v477_v20 = vpop.f32.mrb[13].mxu0  ;;  %586 = vst [vmem:[%s975_s25 + $0xf0] sm:$0xff] %v1083_v19  ;;  %v541_v21 = vpop.f32.mrb[13].mxu1  ;;  %v643_v36 = vmul.f32 %v858_v17, %v858_v17 }
 0x122   : > { %568 = vst [vmem:[%s975_s25 + $0x60] sm:$0xff] %v477_v20  ;;  %v600_v22 = vadd.f32 %v599_v18, %v477_v20  ;;  %v641_v23 = vmul.f32 %v477_v20, %v477_v20  ;;  %v671_v24 = vadd.f32 %v670_v16, %v640_v15  ;;  %v859_v25 = vpop.f32.mrb[14].mxu0  ;;  %584 = vst [vmem:[%s975_s25 + $0xe0] sm:$0xff] %v541_v21  ;;  %v875_v27 = vpop.f32.mrb[14].mxu1 }
 0x123   : > { %571 = vst [vmem:[%s975_s25 + $0x78] sm:$0xff] %v859_v25  ;;  %v480_v29 = vpop.f32.mrb[15].mxu0  ;;  %587 = vst [vmem:[%s975_s25 + $0xf8] sm:$0xff] %v875_v27  ;;  %v544_v31 = vpop.f32.mrb[15].mxu1  ;;  %v644_v39 = vmul.f32 %v859_v25, %v859_v25 }
 0x124   : > { %v672_v33 = vadd.f32 %v671_v24, %v641_v23  ;;  %569 = vst [vmem:[%s975_s25 + $0x68] sm:$0xff] %v480_v29  ;;  %v601_v34 = vadd.f32 %v600_v22, %v480_v29  ;;  %v642_v35 = vmul.f32 %v480_v29, %v480_v29  ;;  %585 = vst [vmem:[%s975_s25 + $0xe8] sm:$0xff] %v544_v31 }
 0x125   : > { %v658_v18 = vmul.f32 %v544_v31, %v544_v31 }
 0x126   : > { %v602_v37 = vadd.f32 %v858_v17, %v601_v34  ;;  %v673_v38 = vadd.f32 %v672_v33, %v642_v35 }
 0x128   : > { %v674_v40 = vadd.f32 %v673_v38, %v643_v36  ;;  %v603_v41 = vadd.f32 %v859_v25, %v602_v37 }
 0x12a   : > { %v604_v44 = vadd.f32 %v603_v41, %v1028_v28  ;;  %v675_v46 = vadd.f32 %v674_v40, %v644_v39  ;;  %v649_v28 = vmul.f32 %v1048_v45, %v1048_v45 }
 0x12c   : > { %v676_v47 = vadd.f32 %v675_v46, %v645_v42  ;;  %v605_v48 = vadd.f32 %v604_v44, %v1038_v32 }
 0x12e   : > { %v606_v53 = vadd.f32 %v1023_v26, %v605_v48  ;;  %v677_v54 = vadd.f32 %v676_v47, %v646_v49  ;;  %v651_v26 = vmul.f32 %v1043_v43, %v1043_v43 }
 0x130   : > { %v678_v56 = vadd.f32 %v677_v54, %v647_v51  ;;  %v607_v57 = vadd.f32 %v1033_v30, %v606_v53  ;;  %v652_v30 = vmul.f32 %v1053_v50, %v1053_v50 }
 0x132   : > { %v608_v58 = vadd.f32 %v607_v57, %v1048_v45  ;;  %v679_v59 = vadd.f32 %v678_v56, %v648_v55  ;;  %v653_v45 = vmul.f32 %v1068_v1, %v1068_v1 }
 0x134   : > { %v680_v60 = vadd.f32 %v679_v59, %v649_v28  ;;  %v609_v32 = vadd.f32 %v608_v58, %v1058_v52 }
 0x136   : > { %v610_v62 = vadd.f32 %v1043_v43, %v609_v32  ;;  %v681_v0 = vadd.f32 %v680_v60, %v650_v61  ;;  %v655_v43 = vmul.f32 %v1063_v63, %v1063_v63 }
 0x138   : > { %v682_v2 = vadd.f32 %v681_v0, %v651_v26  ;;  %v611_v3 = vadd.f32 %v1053_v50, %v610_v62  ;;  %v656_v50 = vmul.f32 %v1073_v6, %v1073_v6 }
 0x13a   : > { %v612_v4 = vadd.f32 %v611_v3, %v1068_v1  ;;  %v683_v5 = vadd.f32 %v682_v2, %v652_v30  ;;  %v657_v1 = vmul.f32 %v541_v21, %v541_v21 }
 0x13c   : > { %v684_v7 = vadd.f32 %v683_v5, %v653_v45  ;;  %v613_v52 = vadd.f32 %v612_v4, %v1078_v8  ;;  %v659_v8 = vmul.f32 %v1083_v19, %v1083_v19 }
 0x13e   : > { %v614_v10 = vadd.f32 %v1063_v63, %v613_v52  ;;  %v685_v11 = vadd.f32 %v684_v7, %v654_v9  ;;  %v660_v63 = vmul.f32 %v875_v27, %v875_v27 }
 0x140   : > { %v686_v12 = vadd.f32 %v685_v11, %v655_v43  ;;  %v615_v13 = vadd.f32 %v1073_v6, %v614_v10 }
 0x142   : > { %v616_v14 = vadd.f32 %v615_v13, %v541_v21  ;;  %v687_v15 = vadd.f32 %v686_v12, %v656_v50 }
 0x144   : > { %v688_v16 = vadd.f32 %v687_v15, %v657_v1  ;;  %v617_v17 = vadd.f32 %v616_v14, %v544_v31  ;;  %v588_v31 = vld [vmem:[%s1151_s3] sm:$0x1] }
 0x146   : > { %v618_v20 = vadd.f32 %v1083_v19, %v617_v17  ;;  %v689_v22 = vadd.f32 %v688_v16, %v658_v18 }
 0x148   : > { %v619_v23 = vadd.f32 %v875_v27, %v618_v20  ;;  %v690_v24 = vadd.f32 %v689_v22, %v659_v8  ;;  %v628_v27 = vld [vmem:[%s1152_s4] sm:$0x1] }
 0x14a   : > { %v620_v25 = vrot.slane %v619_v23, 4  ;;  %v691_v29 = vadd.f32 %v690_v24, %v660_v63 }
 0x14c   : > { %v621_v33 = vadd.f32 %v620_v25, %v619_v23  ;;  %v692_v34 = vrot.slane %v691_v29, 4 }
 0x14e   : > { %v622_v6 = vrot.slane %v621_v33, 2  ;;  %v693_v35 = vadd.f32 %v692_v34, %v691_v29 }
 0x150   : > { %v623_v21 = vadd.f32 %v622_v6, %v621_v33  ;;  %v694_v36 = vrot.slane %v693_v35, 2 }
 0x152   : > { %v624_v37 = vrot.slane %v623_v21, 1  ;;  %v695_v38 = vadd.f32 %v694_v36, %v693_v35 }
 0x154   : > { %v625_v39 = vadd.f32 %v624_v37, %v623_v21  ;;  %v696_v19 = vrot.slane %v695_v38, 1 }
 0x156   : > { %v626_v40 = vadd.f32 %v625_v39, %v588_v31  ;;  %v697_v41 = vadd.f32 %v696_v19, %v695_v38 }
 0x158   : > { %627 = vst [vmem:[%s1151_s3] sm:$0x1] %v626_v40  ;;  %v698_v42 = vadd.f32 %v697_v41, %v628_v27 }
 0x15a   : > { %699 = vst [vmem:[%s1152_s4] sm:$0x1] %v698_v42 }
 0x15b PF: > { %s15_s15 = sadd.s32 1, %s931_s15  }
 0x15c   : > { %p12_p5 = scmp.ge.s32.totalorder %s15_s15, 4  }
 0x15e   :  { %14 = sbr.rel (!%p12_p5) target bundleno = 1 (0x1), region = 78 }

// kernel: resblock_forward.7
= control target key start
LH: loop header
LB: loop body
LE: loop exit
PB: predicated region body
PF: predicated region fallthrough
CT: control target
= control target key end

     0   :  { %s1188_s24 = smov 0   ;;  %s1464_s0 = inlined_call_operand.vmem [shape: f32[512,128], index: 0, kind: input, shape index: {}]   ;;  %s1465_s1 = inlined_call_operand.vmem [shape: f32[1,128], index: 1, kind: input, shape index: {}]   ;;  %s1466_s2 = inlined_call_operand.vmem [shape: f32[1,128], index: 2, kind: input, shape index: {}]   ;;  %s1467_s3 = inlined_call_operand.vmem [shape: f32[1,128], index: 3, kind: input, shape index: {}]   ;;  %s1468_s4 = inlined_call_operand.vmem [shape: f32[1,128], index: 4, kind: input, shape index: {}]   ;;  %s1469_s5 = inlined_call_operand.vmem [shape: bf16[512,128], index: 5, kind: input, shape index: {}]   ;;  %s1470_s6 = inlined_call_operand.vmem [shape: bf16[128,128], index: 6, kind: input, shape index: {}]   ;;  %s1471_s7 = inlined_call_operand.vmem [shape: f32[512,128], index: 7, kind: output, shape index: {}]  }
   0x1 LB: > { %s980_s25 = sadd.s32 4294967295, %s1146_s24   ;;  %p984_p0 = scmp.ge.s32.totalorder %s1146_s24, 1  ;;  %s1146_s24 = sphi %s1188_s24, %s17_s24  }
   0x2   : > { %p249_p1 = scmp.lt.s32.totalorder %s1146_s24, 3 }
   0x4   : > { %p250_p2 = pnand %p984_p0, %p249_p1 }
   0x5   : > { %v1114_v0 = vld [vmem:[%s1470_s6] sm:$0xff] (!%p250_p2)   ;;  %s985_s28 = sshll.u32 (!%p250_p2), %s980_s25, 5  ;;  %v1115_v1 = vld [vmem:[%s1470_s6 + $0x8] sm:$0xff] (!%p250_p2)   ;;  %v1116_v2 = vld [vmem:[%s1470_s6 + $0x10] sm:$0xff] (!%p250_p2)   ;;  %v349_v32 = vlaneseq (!%p250_p2) }
   0x6   : > { %253 = sbr.rel (%p250_p2) target bundleno = 282 (0x11a), region = 48  ;;  %p287_p3 = scmp.lt.s32.totalorder (!%p250_p2), %s985_s28, 63  ;;  %1042 = vmatprep.subr.bf16.mxu0 (!%p250_p2), %v1114_v0  ;;  %1090 = vmatprep.subr.bf16.mxu1 (!%p250_p2), %v1114_v0  ;;  %v1117_v3 = vld [vmem:[%s1470_s6 + $0x18] sm:$0xff] (!%p250_p2)   ;;  %v1118_v6 = vld [vmem:[%s1470_s6 + $0x20] sm:$0xff] (!%p250_p2)   ;;  %v1119_v7 = vld [vmem:[%s1470_s6 + $0x28] sm:$0xff] (!%p250_p2)  }
   0x7   : > { %1043 = vmatpush3.bf16.msra.mxu0 (!%p250_p2), %v1114_v0  ;;  %1098 = vmatpush3.bf16.msra.mxu1 (!%p250_p2), %v1114_v0  ;;  %v1120_v8 = vld [vmem:[%s1470_s6 + $0x30] sm:$0xff] (!%p250_p2)   ;;  %v1121_v9 = vld [vmem:[%s1470_s6 + $0x38] sm:$0xff] (!%p250_p2)   ;;  %v305_v24 = vld [vmem:[%s1465_s1] sm:$0x1] (!%p250_p2)  ;;  %v350_v33 = vshrl.u32 (!%p250_p2), %v349_v32, 7 }
   0x8   : > { %1044 = vmatprep.subr.bf16.mxu0 (!%p250_p2), %v1115_v1  ;;  %1091 = vmatprep.subr.bf16.mxu1 (!%p250_p2), %v1115_v1  ;;  %v306_v25 = vmul.f32 (!%p250_p2), 0.001953125, %v305_v24  ;;  %v307_v26 = vld [vmem:[%s1466_s2] sm:$0x1] (!%p250_p2) }
   0x9   : > { %v308_v27 = vmul.f32 (!%p250_p2), 0.001953125, %v307_v26  ;;  %v351_v34 = vsub.s32 (!%p250_p2), 0, %v350_v33  ;;  %v314_v36 = vld [vmem:[%s1467_s3] sm:$0x1] (!%p250_p2) }
   0xa   : > { %v309_v28 = vmul.f32 (!%p250_p2), %v306_v25, %v306_v25  ;;  %v1288_v60 = vld [vmem:[%s1468_s4] ss:$0 sm:$0xff] (!%p250_p2) }
   0xb   : > { %1045 = vmatpush3.bf16.msra.mxu0 (!%p250_p2), %v1115_v1  ;;  %1099 = vmatpush3.bf16.msra.mxu1 (!%p250_p2), %v1115_v1  ;;  %v1261_v38 = vrot.slane (!%p250_p2), %v306_v25, %v351_v34 }
   0xc   : > { %1046 = vmatprep.subr.bf16.mxu0 (!%p250_p2), %v1116_v2  ;;  %1092 = vmatprep.subr.bf16.mxu1 (!%p250_p2), %v1116_v2  ;;  %v310_v29 = vsub.f32 (!%p250_p2), %v308_v27, %v309_v28 }
   0xd   : > { %s1473_s28 = smov (!%p287_p3, %s985_s28), 63 }
   0xe   : > { %s988_s10 = sshll.u32 %s1473_s28, 2  ;;  %v311_v30 = vmax.f32 %v310_v29, 0.0  ;;  %s986_s30 = sshll.u32 %s1473_s28, 3 }
   0xf   : > { %s1211_s13 = scalar_lea.vmem %s1469_s5, %s988_s10  ;;  %1047 = vmatpush3.bf16.msra.mxu0 %v1116_v2  ;;  %1100 = vmatpush3.bf16.msra.mxu1 %v1116_v2  ;;  %s1259_s12 = scalar_lea.vmem %s1464_s0, %s986_s30 }
  0x10   : > { %v1122_v4 = vld [vmem:[%s1211_s13] sm:$0xff]   ;;  %1048 = vmatprep.subr.bf16.mxu0 %v1117_v3  ;;  %1093 = vmatprep.subr.bf16.mxu1 %v1117_v3  ;;  %v1124_v10 = vld [vmem:[%s1211_s13 + $0x8] sm:$0xff]   ;;  %v1126_v12 = vld [vmem:[%s1211_s13 + $0x10] sm:$0xff]   ;;  %v312_v31 = vadd.f32 1e-05, %v311_v30  ;;  %s1361_s17 = scalar_lea.vmem %s1471_s7, %s986_s30 }
  0x11   : > { %v1123_v5 = vld [vmem:[%s1211_s13 + $0x40] sm:$0xff]   ;;  %1058 = vmatprep.mubr.bf16.mxu0 %v1122_v4  ;;  %v1125_v11 = vld [vmem:[%s1211_s13 + $0x48] sm:$0xff]   ;;  %v1127_v13 = vld [vmem:[%s1211_s13 + $0x50] sm:$0xff]  }
  0x12   : > { %1074 = vmatprep.mubr.bf16.mxu1 %v1123_v5  ;;  %v1128_v14 = vld [vmem:[%s1211_s13 + $0x18] sm:$0xff]   ;;  %v1130_v16 = vld [vmem:[%s1211_s13 + $0x20] sm:$0xff]   ;;  %v1132_v18 = vld [vmem:[%s1211_s13 + $0x28] sm:$0xff]   ;;  %1138 = vrsqrt.f32 %v312_v31 }
  0x13   : > { %1049 = vmatpush3.bf16.msra.mxu0 %v1117_v3  ;;  %1101 = vmatpush3.bf16.msra.mxu1 %v1117_v3  ;;  %v1129_v15 = vld [vmem:[%s1211_s13 + $0x58] sm:$0xff]   ;;  %v1131_v17 = vld [vmem:[%s1211_s13 + $0x60] sm:$0xff]   ;;  %v1133_v19 = vld [vmem:[%s1211_s13 + $0x68] sm:$0xff]  }
  0x14   : > { %1050 = vmatprep.subr.bf16.mxu0 %v1118_v6  ;;  %1094 = vmatprep.subr.bf16.mxu1 %v1118_v6  ;;  %v1134_v20 = vld [vmem:[%s1211_s13 + $0x30] sm:$0xff]   ;;  %v1136_v22 = vld [vmem:[%s1211_s13 + $0x38] sm:$0xff]   ;;  %v316_v41 = vld [vmem:[%s1259_s12] sm:$0xff] }
  0x15   : > { %v1135_v21 = vld [vmem:[%s1211_s13 + $0x70] sm:$0xff]   ;;  %v1137_v23 = vld [vmem:[%s1211_s13 + $0x78] sm:$0xff]   ;;  %v332_v42 = vld [vmem:[%s1259_s12 + $0x80] sm:$0xff]  ;;  %v354_v46 = vsub.f32 %v316_v41, %v1261_v38 }
  0x16   : > { %v318_v39 = vld [vmem:[%s1259_s12 + $0x10] sm:$0xff]  ;;  %v370_v47 = vsub.f32 %v332_v42, %v1261_v38  ;;  %v319_v48 = vld [vmem:[%s1259_s12 + $0x18] sm:$0xff]  ;;  %v317_v50 = vld [vmem:[%s1259_s12 + $0x8] sm:$0xff] }
  0x17   : > { %1051 = vmatpush3.bf16.msra.mxu0 %v1118_v6  ;;  %1102 = vmatpush3.bf16.msra.mxu1 %v1118_v6  ;;  %v334_v40 = vld [vmem:[%s1259_s12 + $0x90] sm:$0xff]  ;;  %v356_v43 = vsub.f32 %v318_v39, %v1261_v38  ;;  %v335_v49 = vld [vmem:[%s1259_s12 + $0x98] sm:$0xff]  ;;  %v333_v51 = vld [vmem:[%s1259_s12 + $0x88] sm:$0xff]  ;;  %v357_v56 = vsub.f32 %v319_v48, %v1261_v38  ;;  %v355_v63 = vsub.f32 %v317_v50, %v1261_v38 }
  0x18   : > { %1052 = vmatprep.subr.bf16.mxu0 %v1119_v7  ;;  %1095 = vmatprep.subr.bf16.mxu1 %v1119_v7  ;;  %v372_v45 = vsub.f32 %v334_v40, %v1261_v38  ;;  %v322_v52 = vld [vmem:[%s1259_s12 + $0x30] sm:$0xff]  ;;  %v373_v57 = vsub.f32 %v335_v49, %v1261_v38  ;;  %v320_v58 = vld [vmem:[%s1259_s12 + $0x20] sm:$0xff]  ;;  %v371_v0 = vsub.f32 %v333_v51, %v1261_v38  ;;  %v323_v5 = vld [vmem:[%s1259_s12 + $0x38] sm:$0xff] }
  0x19   : > { %v338_v53 = vld [vmem:[%s1259_s12 + $0xb0] sm:$0xff]  ;;  %v336_v59 = vld [vmem:[%s1259_s12 + $0xa0] sm:$0xff]  ;;  %v360_v1 = vsub.f32 %v322_v52, %v1261_v38  ;;  %v358_v3 = vsub.f32 %v320_v58, %v1261_v38  ;;  %v339_v6 = vld [vmem:[%s1259_s12 + $0xb8] sm:$0xff] }
  0x1a   : > { %v376_v2 = vsub.f32 %v338_v53, %v1261_v38  ;;  %v374_v4 = vsub.f32 %v336_v59, %v1261_v38  ;;  %v340_v24 = vld [vmem:[%s1259_s12 + $0xc0] sm:$0xff]  ;;  %v343_v39 = vld [vmem:[%s1259_s12 + $0xd8] sm:$0xff]  ;;  %v325_v49 = vld [vmem:[%s1259_s12 + $0x48] sm:$0xff] }
  0x1b   : > { %1053 = vmatpush3.bf16.msra.mxu0 %v1119_v7  ;;  %1103 = vmatpush3.bf16.msra.mxu1 %v1119_v7  ;;  %v341_v50 = vld [vmem:[%s1259_s12 + $0xc8] sm:$0xff] }
  0x1c   : > { %1054 = vmatprep.subr.bf16.mxu0 %v1120_v8  ;;  %1096 = vmatprep.subr.bf16.mxu1 %v1120_v8  ;;  %v1139_v35 = vpop.eup %1138 }
  0x1d   : > { %v315_v37 = vmul.f32 %v1139_v35, %v314_v36  ;;  %v378_v36 = vsub.f32 %v340_v24, %v1261_v38  ;;  %v1374_v24 = vld [vmem:[%s1259_s12 + $0x70] sm:$0xff] }
  0x1f   : > { %1055 = vmatpush3.bf16.msra.mxu0 %v1120_v8  ;;  %1104 = vmatpush3.bf16.msra.mxu1 %v1120_v8  ;;  %v1268_v44 = vrot.slane %v315_v37, %v351_v34  ;;  %v327_v37 = vld [vmem:[%s1259_s12 + $0x58] sm:$0xff] }
  0x20   : > { %1056 = vmatprep.subr.bf16.mxu0 %v1121_v9  ;;  %1097 = vmatprep.subr.bf16.mxu1 %v1121_v9 }
  0x21   : > { %v394_v54 = vmul.f32 %v1268_v44, %v356_v43  ;;  %v410_v55 = vmul.f32 %v1268_v44, %v372_v45  ;;  %v392_v61 = vmul.f32 %v1268_v44, %v354_v46  ;;  %v408_v62 = vmul.f32 %v1268_v44, %v370_v47 }
  0x22   : > { %v396_v25 = vmul.f32 %v1268_v44, %v358_v3  ;;  %v412_v26 = vmul.f32 %v1268_v44, %v374_v4  ;;  %v363_v4 = vsub.f32 %v325_v49, %v1261_v38 }
  0x23   : > { %1057 = vmatpush3.bf16.msra.mxu0 %v1121_v9  ;;  %1105 = vmatpush3.bf16.msra.mxu1 %v1121_v9  ;;  %v433_v7 = vadd.f32 %v1288_v60, %v394_v54  ;;  %v449_v8 = vadd.f32 %v1288_v60, %v410_v55  ;;  %v395_v9 = vmul.f32 %v1268_v44, %v357_v56 }
  0x24   : > { %v1341_v45 = vadd.f32 %v1288_v60, %v396_v25  ;;  %v1344_v46 = vadd.f32 %v1288_v60, %v412_v26  ;;  %v365_v55 = vsub.f32 %v327_v37, %v1261_v38  ;;  %v381_v56 = vsub.f32 %v343_v39, %v1261_v38  ;;  %v1377_v25 = vld [vmem:[%s1259_s12 + $0xf0] sm:$0xff] }
  0x25   : > { %v434_v29 = vadd.f32 %v1288_v60, %v395_v9  ;;  %v384_v49 = vsub.f32 %v1377_v25, %v1261_v38 }
  0x26   : > { %1059 = vmatmul.mubr.bf16.vlgmr.msra.gmra.mrb[0].mxu0 %v1124_v10  ;;  %1075 = vmatmul.mubr.bf16.vlgmr.msra.gmra.mrb[0].mxu1 %v1125_v11  ;;  %v411_v10 = vmul.f32 %v1268_v44, %v373_v57  ;;  %v321_v11 = vld [vmem:[%s1259_s12 + $0x28] sm:$0xff] }
  0x27   : > { %1062 = vmatprep.mubr.bf16.mxu0 %v1126_v12  ;;  %1078 = vmatprep.mubr.bf16.mxu1 %v1127_v13  ;;  %v337_v12 = vld [vmem:[%s1259_s12 + $0xa8] sm:$0xff]  ;;  %v431_v13 = vadd.f32 %v1288_v60, %v392_v61  ;;  %v359_v27 = vsub.f32 %v321_v11, %v1261_v38 }
  0x28   : > { %v375_v28 = vsub.f32 %v337_v12, %v1261_v38  ;;  %v450_v30 = vadd.f32 %v1288_v60, %v411_v10 }
  0x29   : > { %v397_v47 = vmul.f32 %v1268_v44, %v359_v27 }
  0x2a   : > { %v413_v48 = vmul.f32 %v1268_v44, %v375_v28  ;;  %v403_v28 = vmul.f32 %v1268_v44, %v365_v55  ;;  %v347_v55 = vld [vmem:[%s1259_s12 + $0xf8] sm:$0xff] }
  0x2e   : > { %1063 = vmatmul.mubr.bf16.gmra.mrb[4].mxu0 %v1128_v14  ;;  %1079 = vmatmul.mubr.bf16.gmra.mrb[4].mxu1 %v1129_v15  ;;  %v447_v14 = vadd.f32 %v1288_v60, %v408_v62  ;;  %v393_v15 = vmul.f32 %v1268_v44, %v355_v63  ;;  %v416_v63 = vmul.f32 %v1268_v44, %v378_v36 }
  0x2f   : > { %1066 = vmatprep.mubr.bf16.mxu0 %v1130_v16  ;;  %1082 = vmatprep.mubr.bf16.mxu1 %v1131_v17  ;;  %v409_v16 = vmul.f32 %v1268_v44, %v371_v0  ;;  %v326_v17 = vld [vmem:[%s1259_s12 + $0x50] sm:$0xff]  ;;  %v401_v36 = vmul.f32 %v1268_v44, %v363_v4 }
  0x30   : > { %v364_v31 = vsub.f32 %v326_v17, %v1261_v38  ;;  %v432_v33 = vadd.f32 %v1288_v60, %v393_v15 }
  0x31   : > { %v448_v34 = vadd.f32 %v1288_v60, %v409_v16 }
  0x32   : > { %v402_v53 = vmul.f32 %v1268_v44, %v364_v31  ;;  %v344_v31 = vld [vmem:[%s1259_s12 + $0xe0] sm:$0xff] }
  0x34   : > { %v1382_v26 = vadd.f32 %v1288_v60, %v402_v53 }
  0x36   : > { %1067 = vmatmul.mubr.bf16.gmra.mrb[8].mxu0 %v1132_v18  ;;  %1083 = vmatmul.mubr.bf16.gmra.mrb[8].mxu1 %v1133_v19  ;;  %v342_v18 = vld [vmem:[%s1259_s12 + $0xd0] sm:$0xff]  ;;  %v398_v19 = vmul.f32 %v1268_v44, %v360_v1 }
  0x37   : > { %1070 = vmatprep.mubr.bf16.mxu0 %v1134_v20  ;;  %1086 = vmatprep.mubr.bf16.mxu1 %v1135_v21  ;;  %v414_v20 = vmul.f32 %v1268_v44, %v376_v2  ;;  %v361_v21 = vsub.f32 %v323_v5, %v1261_v38  ;;  %v380_v32 = vsub.f32 %v342_v18, %v1261_v38 }
  0x38   : > { %v1333_v40 = vadd.f32 %v1288_v60, %v398_v19  ;;  %v379_v5 = vsub.f32 %v341_v50, %v1261_v38 }
  0x39   : > { %v1336_v41 = vadd.f32 %v1288_v60, %v414_v20  ;;  %v399_v42 = vmul.f32 %v1268_v44, %v361_v21  ;;  %v418_v54 = vmul.f32 %v1268_v44, %v380_v32 }
  0x3a   : > { %v417_v37 = vmul.f32 %v1268_v44, %v379_v5 }
  0x3b   : > { %v438_v18 = vadd.f32 %v1288_v60, %v399_v42  ;;  %v1385_v27 = vadd.f32 %v1288_v60, %v418_v54  ;;  %v331_v54 = vld [vmem:[%s1259_s12 + $0x78] sm:$0xff] }
  0x3c   : > { %v369_v5 = vsub.f32 %v331_v54, %v1261_v38 }
  0x3e   : > { %1071 = vmatmul.mubr.bf16.gmra.mrb[12].mxu0 %v1136_v22  ;;  %1087 = vmatmul.mubr.bf16.gmra.mrb[12].mxu1 %v1137_v23  ;;  %v377_v22 = vsub.f32 %v339_v6, %v1261_v38  ;;  %v324_v23 = vld [vmem:[%s1259_s12 + $0x40] sm:$0xff] }
  0x3f   : > { %v362_v35 = vsub.f32 %v324_v23, %v1261_v38  ;;  %v452_v23 = vadd.f32 %v1288_v60, %v413_v48  ;;  %v368_v48 = vsub.f32 %v1374_v24, %v1261_v38  ;;  %v407_v24 = vmul.f32 %v1268_v44, %v369_v5 }
  0x40   : > { %v415_v43 = vmul.f32 %v1268_v44, %v377_v22  ;;  %v436_v22 = vadd.f32 %v1288_v60, %v397_v47 }
  0x41   : > { %v400_v62 = vmul.f32 %v1268_v44, %v362_v35  ;;  %v455_v35 = vadd.f32 %v1288_v60, %v416_v63 }
  0x42   : > { %v454_v19 = vadd.f32 %v1288_v60, %v415_v43 }
  0xf9   : > { %v1060_v51 = vpop.f32.mrb[0].mxu0  ;;  %v1076_v52 = vpop.f32.mrb[0].mxu1 }
  0xfa   : > { %v818_v57 = vadd.f32 %v1060_v51, %v433_v7  ;;  %v834_v58 = vadd.f32 %v1076_v52, %v449_v8  ;;  %v689_v59 = vpop.f32.mrb[1].mxu0  ;;  %v753_v61 = vpop.f32.mrb[1].mxu1 }
  0xfb   : > { %v816_v0 = vadd.f32 %v689_v59, %v431_v13  ;;  %v832_v1 = vadd.f32 %v753_v61, %v447_v14  ;;  %v1061_v2 = vpop.f32.mrb[2].mxu0  ;;  %v1077_v3 = vpop.f32.mrb[2].mxu1 }
  0xfc   : > { %v850_v6 = vmax.f32 %v818_v57, 0.0  ;;  %v866_v7 = vmax.f32 %v834_v58, 0.0  ;;  %v819_v8 = vadd.f32 %v1061_v2, %v434_v29  ;;  %v835_v9 = vadd.f32 %v1077_v3, %v450_v30  ;;  %v692_v10 = vpop.f32.mrb[3].mxu0  ;;  %v756_v11 = vpop.f32.mrb[3].mxu1  ;;  %v328_v30 = vld [vmem:[%s1259_s12 + $0x60] sm:$0xff] }
  0xfd   : > { %v848_v12 = vmax.f32 %v816_v0, 0.0  ;;  %v864_v13 = vmax.f32 %v832_v1, 0.0  ;;  %v817_v14 = vadd.f32 %v692_v10, %v432_v33  ;;  %v833_v15 = vadd.f32 %v756_v11, %v448_v34 }
  0xfe   : > { %882 = vst [vmem:[%s1361_s17 + $0x10] sm:$0xff] %v850_v6  ;;  %898 = vst [vmem:[%s1361_s17 + $0x90] sm:$0xff] %v866_v7  ;;  %v851_v16 = vmax.f32 %v819_v8, 0.0  ;;  %v867_v17 = vmax.f32 %v835_v9, 0.0  ;;  %v419_v29 = vmul.f32 %v1268_v44, %v381_v56  ;;  %v439_v34 = vadd.f32 %v1288_v60, %v400_v62  ;;  %v329_v62 = vld [vmem:[%s1259_s12 + $0x68] sm:$0xff] }
  0xff   : > { %880 = vst [vmem:[%s1361_s17] sm:$0xff] %v848_v12  ;;  %896 = vst [vmem:[%s1361_s17 + $0x80] sm:$0xff] %v864_v13  ;;  %v849_v20 = vmax.f32 %v817_v14, 0.0  ;;  %v865_v21 = vmax.f32 %v833_v15, 0.0  ;;  %v385_v6 = vsub.f32 %v347_v55, %v1261_v38  ;;  %v367_v9 = vsub.f32 %v329_v62, %v1261_v38 }
 0x100   : > { %883 = vst [vmem:[%s1361_s17 + $0x18] sm:$0xff] %v851_v16  ;;  %899 = vst [vmem:[%s1361_s17 + $0x98] sm:$0xff] %v867_v17  ;;  %v442_v11 = vadd.f32 %v1288_v60, %v403_v28  ;;  %v458_v12 = vadd.f32 %v1288_v60, %v419_v29  ;;  %v440_v13 = vadd.f32 %v1288_v60, %v401_v36 }
 0x101   : > { %881 = vst [vmem:[%s1361_s17 + $0x8] sm:$0xff] %v849_v20  ;;  %897 = vst [vmem:[%s1361_s17 + $0x88] sm:$0xff] %v865_v21  ;;  %v1064_v32 = vpop.f32.mrb[4].mxu0  ;;  %v1080_v33 = vpop.f32.mrb[4].mxu1  ;;  %v456_v14 = vadd.f32 %v1288_v60, %v417_v37  ;;  %v406_v17 = vmul.f32 %v1268_v44, %v368_v48  ;;  %v423_v25 = vmul.f32 %v1268_v44, %v385_v6 }
 0x102   : > { %v822_v39 = vadd.f32 %v1064_v32, %v1333_v40  ;;  %v838_v42 = vadd.f32 %v1080_v33, %v1336_v41  ;;  %v705_v43 = vpop.f32.mrb[5].mxu0  ;;  %v769_v47 = vpop.f32.mrb[5].mxu1  ;;  %v366_v40 = vsub.f32 %v328_v30, %v1261_v38  ;;  %v382_v41 = vsub.f32 %v344_v31, %v1261_v38 }
 0x103   : > { %v820_v50 = vadd.f32 %v705_v43, %v1341_v45  ;;  %v836_v51 = vadd.f32 %v769_v47, %v1344_v46  ;;  %v1065_v52 = vpop.f32.mrb[6].mxu0  ;;  %v1081_v53 = vpop.f32.mrb[6].mxu1  ;;  %v345_v46 = vld [vmem:[%s1259_s12 + $0xe8] sm:$0xff]  ;;  %v405_v32 = vmul.f32 %v1268_v44, %v367_v9  ;;  %v462_v54 = vadd.f32 %v1288_v60, %v423_v25 }
 0x104   : > { %v854_v56 = vmax.f32 %v822_v39, 0.0  ;;  %v870_v57 = vmax.f32 %v838_v42, 0.0  ;;  %v823_v58 = vadd.f32 %v1065_v52, %v438_v18  ;;  %v839_v59 = vadd.f32 %v1081_v53, %v454_v19  ;;  %v708_v61 = vpop.f32.mrb[7].mxu0  ;;  %v772_v45 = vpop.f32.mrb[7].mxu1 }
 0x105   : > { %v852_v63 = vmax.f32 %v820_v50, 0.0  ;;  %v868_v0 = vmax.f32 %v836_v51, 0.0  ;;  %v821_v1 = vadd.f32 %v708_v61, %v436_v22  ;;  %v837_v2 = vadd.f32 %v772_v45, %v452_v23 }
 0x106   : > { %886 = vst [vmem:[%s1361_s17 + $0x30] sm:$0xff] %v854_v56  ;;  %902 = vst [vmem:[%s1361_s17 + $0xb0] sm:$0xff] %v870_v57  ;;  %v855_v3 = vmax.f32 %v823_v58, 0.0  ;;  %v871_v4 = vmax.f32 %v839_v59, 0.0  ;;  %v383_v10 = vsub.f32 %v345_v46, %v1261_v38  ;;  %v422_v18 = vmul.f32 %v1268_v44, %v384_v49 }
 0x107   : > { %884 = vst [vmem:[%s1361_s17 + $0x20] sm:$0xff] %v852_v63  ;;  %900 = vst [vmem:[%s1361_s17 + $0xa0] sm:$0xff] %v868_v0  ;;  %v853_v7 = vmax.f32 %v821_v1, 0.0  ;;  %v869_v8 = vmax.f32 %v837_v2, 0.0  ;;  %v404_v38 = vmul.f32 %v1268_v44, %v366_v40  ;;  %v420_v19 = vmul.f32 %v1268_v44, %v382_v41 }
 0x108   : > { %887 = vst [vmem:[%s1361_s17 + $0x38] sm:$0xff] %v855_v3  ;;  %903 = vst [vmem:[%s1361_s17 + $0xb8] sm:$0xff] %v871_v4  ;;  %v421_v33 = vmul.f32 %v1268_v44, %v383_v10  ;;  %v445_v49 = vadd.f32 %v1288_v60, %v406_v17  ;;  %v461_v50 = vadd.f32 %v1288_v60, %v422_v18 }
 0x109   : > { %885 = vst [vmem:[%s1361_s17 + $0x28] sm:$0xff] %v853_v7  ;;  %901 = vst [vmem:[%s1361_s17 + $0xa8] sm:$0xff] %v869_v8  ;;  %v1068_v15 = vpop.f32.mrb[8].mxu0  ;;  %v1084_v16 = vpop.f32.mrb[8].mxu1  ;;  %v443_v53 = vadd.f32 %v1288_v60, %v404_v38  ;;  %v459_v40 = vadd.f32 %v1288_v60, %v420_v19  ;;  %v446_v41 = vadd.f32 %v1288_v60, %v407_v24 }
 0x10a   : > { %v826_v20 = vadd.f32 %v1068_v15, %v1382_v26  ;;  %v842_v21 = vadd.f32 %v1084_v16, %v1385_v27  ;;  %v721_v22 = vpop.f32.mrb[9].mxu0  ;;  %v785_v23 = vpop.f32.mrb[9].mxu1  ;;  %v444_v57 = vadd.f32 %v1288_v60, %v405_v32  ;;  %v460_v58 = vadd.f32 %v1288_v60, %v421_v33 }
 0x10b   : > { %v824_v28 = vadd.f32 %v721_v22, %v439_v34  ;;  %v840_v29 = vadd.f32 %v785_v23, %v455_v35  ;;  %v1069_v30 = vpop.f32.mrb[10].mxu0  ;;  %v1085_v31 = vpop.f32.mrb[10].mxu1 }
 0x10c   : > { %v858_v36 = vmax.f32 %v826_v20, 0.0  ;;  %v874_v26 = vmax.f32 %v842_v21, 0.0  ;;  %v827_v27 = vadd.f32 %v1069_v30, %v442_v11  ;;  %v843_v37 = vadd.f32 %v1085_v31, %v458_v12  ;;  %v724_v39 = vpop.f32.mrb[11].mxu0  ;;  %v788_v42 = vpop.f32.mrb[11].mxu1 }
 0x10d   : > { %v856_v43 = vmax.f32 %v824_v28, 0.0  ;;  %v872_v34 = vmax.f32 %v840_v29, 0.0  ;;  %v825_v35 = vadd.f32 %v724_v39, %v440_v13  ;;  %v841_v47 = vadd.f32 %v788_v42, %v456_v14 }
 0x10e   : > { %890 = vst [vmem:[%s1361_s17 + $0x50] sm:$0xff] %v858_v36  ;;  %906 = vst [vmem:[%s1361_s17 + $0xd0] sm:$0xff] %v874_v26  ;;  %v859_v48 = vmax.f32 %v827_v27, 0.0  ;;  %v875_v44 = vmax.f32 %v843_v37, 0.0 }
 0x10f   : > { %888 = vst [vmem:[%s1361_s17 + $0x40] sm:$0xff] %v856_v43  ;;  %904 = vst [vmem:[%s1361_s17 + $0xc0] sm:$0xff] %v872_v34  ;;  %v857_v51 = vmax.f32 %v825_v35, 0.0  ;;  %v873_v52 = vmax.f32 %v841_v47, 0.0 }
 0x110   : > { %891 = vst [vmem:[%s1361_s17 + $0x58] sm:$0xff] %v859_v48  ;;  %907 = vst [vmem:[%s1361_s17 + $0xd8] sm:$0xff] %v875_v44 }
 0x111   : > { %889 = vst [vmem:[%s1361_s17 + $0x48] sm:$0xff] %v857_v51  ;;  %905 = vst [vmem:[%s1361_s17 + $0xc8] sm:$0xff] %v873_v52  ;;  %v1072_v55 = vpop.f32.mrb[12].mxu0  ;;  %v1088_v56 = vpop.f32.mrb[12].mxu1 }
 0x112   : > { %v830_v59 = vadd.f32 %v1072_v55, %v445_v49  ;;  %v846_v61 = vadd.f32 %v1088_v56, %v461_v50  ;;  %v737_v45 = vpop.f32.mrb[13].mxu0  ;;  %v801_v62 = vpop.f32.mrb[13].mxu1 }
 0x113   : > { %v828_v46 = vadd.f32 %v737_v45, %v443_v53  ;;  %v844_v63 = vadd.f32 %v801_v62, %v459_v40  ;;  %v1073_v0 = vpop.f32.mrb[14].mxu0  ;;  %v1089_v1 = vpop.f32.mrb[14].mxu1 }
 0x114   : > { %v862_v2 = vmax.f32 %v830_v59, 0.0  ;;  %v878_v3 = vmax.f32 %v846_v61, 0.0  ;;  %v831_v4 = vadd.f32 %v1073_v0, %v446_v41  ;;  %v847_v5 = vadd.f32 %v1089_v1, %v462_v54  ;;  %v740_v6 = vpop.f32.mrb[15].mxu0  ;;  %v804_v60 = vpop.f32.mrb[15].mxu1 }
 0x115   : > { %v860_v7 = vmax.f32 %v828_v46, 0.0  ;;  %v876_v8 = vmax.f32 %v844_v63, 0.0  ;;  %v829_v9 = vadd.f32 %v740_v6, %v444_v57  ;;  %v845_v10 = vadd.f32 %v804_v60, %v460_v58 }
 0x116   : > { %894 = vst [vmem:[%s1361_s17 + $0x70] sm:$0xff] %v862_v2  ;;  %910 = vst [vmem:[%s1361_s17 + $0xf0] sm:$0xff] %v878_v3  ;;  %v863_v11 = vmax.f32 %v831_v4, 0.0  ;;  %v879_v12 = vmax.f32 %v847_v5, 0.0 }
 0x117   : > { %892 = vst [vmem:[%s1361_s17 + $0x60] sm:$0xff] %v860_v7  ;;  %908 = vst [vmem:[%s1361_s17 + $0xe0] sm:$0xff] %v876_v8  ;;  %v861_v13 = vmax.f32 %v829_v9, 0.0  ;;  %v877_v14 = vmax.f32 %v845_v10, 0.0 }
 0x118   : > { %895 = vst [vmem:[%s1361_s17 + $0x78] sm:$0xff] %v863_v11  ;;  %911 = vst [vmem:[%s1361_s17 + $0xf8] sm:$0xff] %v879_v12 }
 0x119   : > { %893 = vst [vmem:[%s1361_s17 + $0x68] sm:$0xff] %v861_v13  ;;  %909 = vst [vmem:[%s1361_s17 + $0xe8] sm:$0xff] %v877_v14 }
 0x11a PF: > { %s17_s24 = sadd.s32 1, %s1146_s24  }
 0x11b   : > { %p14_p4 = scmp.ge.s32.totalorder %s17_s24, 4  }
 0x11d   :  { %16 = sbr.rel (!%p14_p4) target bundleno = 1 (0x1), region = 81 }

</bundles_post_ra>
